<compile_context>
chip_gen: v5e
topology: v5e:2x2
jax: 0.10.0
libtpu: 0.0.40
codegen_flags: <defaults>
</compile_context>

<pallas_src>
import math

import jax
import jax.numpy as jnp
from jax import lax
from jax.experimental import pallas as pl
from jax.experimental.pallas import tpu as pltpu

PRIOR_PI = 0.5
PRIOR_SIGMA1 = 1.0
PRIOR_SIGMA2 = 0.002

_LOG_2PI = math.log(2.0 * math.pi)
_NEG_HALF_LOG_2PI = -0.5 * _LOG_2PI
# Per-element constants hoisted out of the kernel (added once in the wrapper).
_LOG_Q_CONST = _NEG_HALF_LOG_2PI
_LOG_MIX_CONST = _NEG_HALF_LOG_2PI - math.log(PRIOR_SIGMA1) + math.log(PRIOR_PI)

# Mixture coefficients: delta = log-odds of the narrow component (up to the hoisted const).
_INV_2S1 = 0.5 / (PRIOR_SIGMA1 * PRIOR_SIGMA1)
_INV_2S2 = 0.5 / (PRIOR_SIGMA2 * PRIOR_SIGMA2)
_DELTA_MUL = _INV_2S1 - _INV_2S2
_DELTA_ADD = math.log(PRIOR_SIGMA1 / PRIOR_SIGMA2) + math.log((1.0 - PRIOR_PI) / PRIOR_PI)


def _softplus(x):
    # Stable softplus: max(x, 0) + log(1 + exp(-|x|)); identical to log(1+exp(x)) for the
    # negative rho range the module initializes with, never overflows.
    return jnp.maximum(x, 0.0) + jnp.log(1.0 + jnp.exp(-jnp.abs(x)))


def _log_mixture_var(x2):
    # Variable part of log(pi*N(x;0,s1) + (1-pi)*N(x;0,s2)); the per-element constant
    # _LOG_MIX_CONST is added once in the wrapper.  One exp + one log per element (EUP slot),
    # no selects (the pi weighting is folded into _DELTA_ADD).
    delta = x2 * _DELTA_MUL + _DELTA_ADD
    return (-_INV_2S1) * x2 + jnp.maximum(delta, 0.0) + jnp.log(1.0 + jnp.exp(-jnp.abs(delta)))


def _kernel(x_ref, mu_w_ref, rho_w_ref, eps_w_ref,
            mu_b_ref, rho_b_ref, eps_b_ref,
            y_ref, part_ref, lq_ref, lp_ref):
    kj = pl.program_id(1)

    @pl.when(kj == 0)
    def _init():
        y_ref[...] = jnp.zeros_like(y_ref)
        lq_ref[...] = jnp.zeros_like(lq_ref)
        lp_ref[...] = jnp.zeros_like(lp_ref)

    eps_w = eps_w_ref[...]                                   # [tn, tk], native [out, in]
    sigma_w = _softplus(rho_w_ref[...])
    weight = mu_w_ref[...] + sigma_w * eps_w                 # sampled weight tile

    # MXU: y += x @ W^T (contract x dim 1 against weight dim 1; no wrapper transpose,
    # Mosaic feeds the sampled tile through the XLU which is otherwise idle here).
    y_ref[...] += lax.dot_general(
        x_ref[...], weight,
        dimension_numbers=(((1,), (1,)), ((), ())),
        preferred_element_type=jnp.float32)

    # Variational posterior log q(w): (w-mu)^2/(2 sigma^2) == eps^2/2 exactly.
    # Prior log p(w): scale mixture.  Reduce over sublanes only per step into lane-binned
    # (1, tk) partials; the cross-lane reduce happens once per N tile at finalize.
    lq_ref[...] += jnp.sum(-jnp.log(sigma_w) - 0.5 * (eps_w * eps_w),
                           axis=0, keepdims=True)
    lp_ref[...] += jnp.sum(_log_mixture_var(weight * weight),
                           axis=0, keepdims=True)

    @pl.when(kj == pl.num_programs(1) - 1)
    def _finalize():
        eps_b = eps_b_ref[...]                               # [1, tn]
        sigma_b = _softplus(rho_b_ref[...])
        bias = mu_b_ref[...] + sigma_b * eps_b

        y_ref[...] = y_ref[...] + bias                       # lane-dense store

        lqw = jnp.sum(lq_ref[...], axis=1, keepdims=True)    # (1, 1)
        lpw = jnp.sum(lp_ref[...], axis=1, keepdims=True)
        lqb = jnp.sum(-jnp.log(sigma_b) - 0.5 * (eps_b * eps_b),
                      axis=(0, 1), keepdims=True)
        lpb = jnp.sum(_log_mixture_var(bias * bias), axis=(0, 1), keepdims=True)

        # Pack the four per-N-tile partial sums into one lane-dense (8,128) slab:
        # lane 0 = log_qw, 1 = log_pw, 2 = log_qb, 3 = log_pb (variable parts).
        lane = lax.broadcasted_iota(jnp.int32, (8, 128), 1)
        part_ref[...] = (jnp.where(lane == 0, lqw, 0.0)
                         + jnp.where(lane == 1, lpw, 0.0)
                         + jnp.where(lane == 2, lqb, 0.0)
                         + jnp.where(lane == 3, lpb, 0.0))


# ------------------------- tiling / VMEM-budget helpers -------------------------

def _pick_tile(dim, desired, *, prefer_split=False):
    cands = sorted({c for c in (desired, 1024, 512, 256, 128)
                    if c <= desired and c <= dim and dim % c == 0}, reverse=True)
    if not cands:
        return dim                       # ragged dim: single full-extent block
    if prefer_split:
        for c in cands:
            if dim // c >= 2:            # keep >=2 N tiles so v7x megacore can shard nj
                return c
    return cands[0]


def _footprint_bytes(B, tn, tk):
    w = 3 * 2 * tn * tk * 4              # mu/rho/eps weight tiles, double-buffered f32
    xb = 2 * B * tk * 4                  # x tiles
    yb = 2 * B * tn * 4                  # resident y block (+ writeback buffer)
    bias = 3 * 2 * 8 * tn * 4            # (1, tn) bias blocks (sublane-padded)
    misc = 2 * 8 * 128 * 4 + 2 * 8 * tk * 4
    return w + xb + yb + bias + misc


def _vmem_budget_bytes():
    try:
        cap = int(pltpu.get_tpu_info().vmem_capacity_bytes)  # 64 MiB/TC v7x, 128 MiB v5e/v6e
    except Exception:
        cap = 64 * 1024 * 1024
    return min(cap * 3 // 5, 96 * 1024 * 1024)


def _choose_tiles(B, K, O, block_n, block_k):
    budget = _vmem_budget_bytes()
    tn = _pick_tile(O, block_n, prefer_split=True)
    tk = _pick_tile(K, block_k)
    # Shrink the K tile first, then the N tile, until the double-buffered set fits.
    while _footprint_bytes(B, tn, tk) > budget:
        if tk > 128:
            nxt = _pick_tile(K, tk // 2)
            if nxt < tk:
                tk = nxt
                continue
        if tn > 128:
            nxt = _pick_tile(O, tn // 2, prefer_split=True)
            if nxt < tn:
                tn = nxt
                continue
        break
    fp = _footprint_bytes(B, tn, tk)
    vmem_limit = int(min(budget, max(32 * 1024 * 1024, fp * 3 // 2)))
    vmem_limit = max(vmem_limit, fp)
    return tn, tk, vmem_limit


# ------------------------------------ wrapper ------------------------------------

def bbb_linear(x, mu_w, rho_w, eps_w, mu_b, rho_b, eps_b, *, block_n=1024, block_k=1024):
    """y = x @ W^T + b with W, b sampled via the reparameterization trick; also returns the
    four KL log-prob sums (log_qw, log_qb, log_pw, log_pb)."""
    B, K = x.shape
    O = mu_w.shape[0]
    tn, tk, vmem_limit = _choose_tiles(B, K, O, block_n, block_k)
    n_n, n_k = O // tn, K // tk

    mu_b2 = mu_b.reshape(1, O)
    rho_b2 = rho_b.reshape(1, O)
    eps_b2 = eps_b.reshape(1, O)

    # Weight-shaped params are read in their native [out_features, in_features] layout
    # -- no wrapper-side transpose / HBM re-materialization.
    w_spec = pl.BlockSpec((tn, tk), lambda nj, kj: (nj, kj))
    b_spec = pl.BlockSpec((1, tn), lambda nj, kj: (0, nj))

    y, partials = pl.pallas_call(
        _kernel,
        out_shape=(
            jax.ShapeDtypeStruct((B, O), jnp.float32),
            jax.ShapeDtypeStruct((n_n * 8, 128), jnp.float32),
        ),
        grid_spec=pltpu.PrefetchScalarGridSpec(
            num_scalar_prefetch=0,
            grid=(n_n, n_k),                                     # K innermost (reduction)
            in_specs=[
                pl.BlockSpec((B, tk), lambda nj, kj: (0, kj)),   # x
                w_spec, w_spec, w_spec,                           # mu_w, rho_w, eps_w  [O, K]
                b_spec, b_spec, b_spec,                           # mu_b, rho_b, eps_b  [1, O]
            ],
            out_specs=(
                pl.BlockSpec((B, tn), lambda nj, kj: (0, nj)),    # y (resident over kj)
                pl.BlockSpec((8, 128), lambda nj, kj: (nj, 0)),   # packed partial sums
            ),
            scratch_shapes=[
                pltpu.VMEM((1, tk), jnp.float32),                 # log_qw lane-binned partial
                pltpu.VMEM((1, tk), jnp.float32),                 # log_pw lane-binned partial
            ],
        ),
        compiler_params=pltpu.CompilerParams(
            dimension_semantics=("parallel", "arbitrary"),
            vmem_limit_bytes=vmem_limit,
        ),
    )(x, mu_w, rho_w, eps_w, mu_b2, rho_b2, eps_b2)

    p = partials.reshape(n_n, 8, 128)[:, 0, :]
    n_w = K * O
    log_qw = p[:, 0].sum() + _LOG_Q_CONST * n_w
    log_pw = p[:, 1].sum() + _LOG_MIX_CONST * n_w
    log_qb = p[:, 2].sum() + _LOG_Q_CONST * O
    log_pb = p[:, 3].sum() + _LOG_MIX_CONST * O
    return y.astype(x.dtype), log_qw, log_qb, log_pw, log_pb


# ---------------- pure-JAX reference (mirrors the torch module verbatim) ----------------

def _ref_log_gaussian(x, mu, sigma):
    return -0.5 * jnp.log(2.0 * math.pi * sigma ** 2) - (x - mu) ** 2 / (2.0 * sigma ** 2)


def _ref_normal_log_prob(x, sigma):
    return -(x * x) / (2.0 * sigma * sigma) - math.log(sigma) - 0.5 * _LOG_2PI


def _ref_log_mixture(x):
    comp1 = _ref_normal_log_prob(x, PRIOR_SIGMA1)
    comp2 = _ref_normal_log_prob(x, PRIOR_SIGMA2)
    m = jnp.maximum(comp1, comp2)
    return m + jnp.log(PRIOR_PI * jnp.exp(comp1 - m) + (1.0 - PRIOR_PI) * jnp.exp(comp2 - m))


def reference(x, mu_w, rho_w, eps_w, mu_b, rho_b, eps_b):
    sigma_w = jnp.log(1.0 + jnp.exp(rho_w))
    weight = mu_w + sigma_w * eps_w
    sigma_b = jnp.log(1.0 + jnp.exp(rho_b))
    bias = mu_b + sigma_b * eps_b
    lqw = jnp.sum(_ref_log_gaussian(weight, mu_w, sigma_w))
    lqb = jnp.sum(_ref_log_gaussian(bias, mu_b, sigma_b))
    lpw = jnp.sum(_ref_log_mixture(weight))
    lpb = jnp.sum(_ref_log_mixture(bias))
    y = x @ weight.T + bias
    return y, lqw, lqb, lpw, lpb


if __name__ == "__main__":
    # Hardware-friendly small demo: B = 8 sublanes, feature dims multiples of 128.
    B, IN_F, OUT_F = 8, 256, 384

    key = jax.random.PRNGKey(0)
    k_x, k_mw, k_rw, k_mb, k_rb, k_ew, k_eb = jax.random.split(key, 7)

    x = jax.random.normal(k_x, (B, IN_F), dtype=jnp.float32)
    # Parameter init matching the torch __init__ distributions (deterministic here).
    mu_w = jax.random.uniform(k_mw, (OUT_F, IN_F), jnp.float32, -0.2, 0.2)
    rho_w = jax.random.uniform(k_rw, (OUT_F, IN_F), jnp.float32, -5.0, -4.0)
    mu_b = jax.random.uniform(k_mb, (OUT_F,), jnp.float32, -0.2, 0.2)
    rho_b = jax.random.uniform(k_rb, (OUT_F,), jnp.float32, -5.0, -4.0)
    # Reparameterization noise (torch.randn_like) -- deterministic explicit inputs.
    eps_w = jax.random.normal(k_ew, (OUT_F, IN_F), dtype=jnp.float32)
    eps_b = jax.random.normal(k_eb, (OUT_F,), dtype=jnp.float32)

    # 128-wide tiles so the small demo exercises a real (3, 2) grid; real sizes use 1024.
    y, lqw, lqb, lpw, lpb = bbb_linear(x, mu_w, rho_w, eps_w, mu_b, rho_b, eps_b,
                                       block_n=128, block_k=128)
    jax.block_until_ready((y, lqw, lqb, lpw, lpb))

    y_r, lqw_r, lqb_r, lpw_r, lpb_r = reference(x, mu_w, rho_w, eps_w, mu_b, rho_b, eps_b)
    assert jnp.allclose(y, y_r, rtol=1e-4, atol=1e-4)
    assert jnp.allclose(lqw, lqw_r, rtol=1e-4, atol=1e-2)
    assert jnp.allclose(lqb, lqb_r, rtol=1e-4, atol=1e-2)
    assert jnp.allclose(lpw, lpw_r, rtol=1e-4, atol=1e-2)
    assert jnp.allclose(lpb, lpb_r, rtol=1e-4, atol=1e-2)

    print("KERNEL_OK")
</pallas_src>

<mosaic_0001>
module attributes {stable_mosaic.version = 11 : i64} {
  func.func @_kernel(%arg0: i32, %arg1: i32, %arg2: memref<8x128xf32, #tpu.memory_space<vmem>>, %arg3: memref<128x128xf32, #tpu.memory_space<vmem>>, %arg4: memref<128x128xf32, #tpu.memory_space<vmem>>, %arg5: memref<128x128xf32, #tpu.memory_space<vmem>>, %arg6: memref<1x128xf32, #tpu.memory_space<vmem>>, %arg7: memref<1x128xf32, #tpu.memory_space<vmem>>, %arg8: memref<1x128xf32, #tpu.memory_space<vmem>>, %arg9: memref<8x128xf32, #tpu.memory_space<vmem>>, %arg10: memref<8x128xf32, #tpu.memory_space<vmem>>, %arg11: memref<1x128xf32, #tpu.memory_space<vmem>>, %arg12: memref<1x128xf32, #tpu.memory_space<vmem>>) attributes {dimension_semantics = [#tpu.dimension_semantics<parallel>, #tpu.dimension_semantics<arbitrary>], iteration_bounds = array<i64: 3, 2>, scalar_prefetch = 0 : i64, scratch_operands = 2 : i64, tpu.core_type = #tpu.core_type<tc>, window_params = [{transform_indices = @transform_0, window_bounds = array<i64: 8, 128>}, {transform_indices = @transform_1, window_bounds = array<i64: 128, 128>}, {transform_indices = @transform_2, window_bounds = array<i64: 128, 128>}, {transform_indices = @transform_3, window_bounds = array<i64: 128, 128>}, {transform_indices = @transform_4, window_bounds = array<i64: 1, 128>}, {transform_indices = @transform_5, window_bounds = array<i64: 1, 128>}, {transform_indices = @transform_6, window_bounds = array<i64: 1, 128>}, {transform_indices = @transform_7, window_bounds = array<i64: 8, 128>}, {transform_indices = @transform_8, window_bounds = array<i64: 8, 128>}]} {
    %c0_i32 = arith.constant 0 : i32
    %0 = arith.cmpi eq, %arg1, %c0_i32 : i32
    %1 = arith.extui %0 : i1 to i32
    %c0_i32_0 = arith.constant 0 : i32
    %2 = arith.cmpi ne, %1, %c0_i32_0 : i32
    scf.if %2 {
      %cst_34 = arith.constant 0.000000e+00 : f32
      %61 = vector.broadcast %cst_34 : f32 to vector<8x128xf32>
      %c0_35 = arith.constant 0 : index
      %c0_36 = arith.constant 0 : index
      %62 = vector.load %arg9[%c0_35, %c0_36] : memref<8x128xf32, #tpu.memory_space<vmem>>, vector<8x128xf32>
      tpu.vector_store %arg9[%c0_35, %c0_36], %61 {strides = array<i32>} : memref<8x128xf32, #tpu.memory_space<vmem>>, vector<8x128xf32>,
      %cst_37 = arith.constant 0.000000e+00 : f32
      %63 = vector.broadcast %cst_37 : f32 to vector<1x128xf32>
      %c0_38 = arith.constant 0 : index
      %c0_39 = arith.constant 0 : index
      %64 = vector.load %arg11[%c0_38, %c0_39] : memref<1x128xf32, #tpu.memory_space<vmem>>, vector<1x128xf32>
      tpu.vector_store %arg11[%c0_38, %c0_39], %63 {strides = array<i32>} : memref<1x128xf32, #tpu.memory_space<vmem>>, vector<1x128xf32>,
      %cst_40 = arith.constant 0.000000e+00 : f32
      %65 = vector.broadcast %cst_40 : f32 to vector<1x128xf32>
      %c0_41 = arith.constant 0 : index
      %c0_42 = arith.constant 0 : index
      %66 = vector.load %arg12[%c0_41, %c0_42] : memref<1x128xf32, #tpu.memory_space<vmem>>, vector<1x128xf32>
      tpu.vector_store %arg12[%c0_41, %c0_42], %65 {strides = array<i32>} : memref<1x128xf32, #tpu.memory_space<vmem>>, vector<1x128xf32>,
    } else {
    }
    %c0 = arith.constant 0 : index
    %c0_1 = arith.constant 0 : index
    %3 = vector.load %arg5[%c0, %c0_1] : memref<128x128xf32, #tpu.memory_space<vmem>>, vector<128x128xf32>
    %c0_2 = arith.constant 0 : index
    %c0_3 = arith.constant 0 : index
    %4 = vector.load %arg4[%c0_2, %c0_3] : memref<128x128xf32, #tpu.memory_space<vmem>>, vector<128x128xf32>
    %cst = arith.constant 0.000000e+00 : f32
    %5 = vector.broadcast %cst : f32 to vector<128x128xf32>
    %6 = arith.maximumf %4, %5 : vector<128x128xf32>
    %7 = math.absf %4 : vector<128x128xf32>
    %cst_4 = arith.constant 0.000000e+00 : f32
    %8 = vector.broadcast %cst_4 : f32 to vector<128x128xf32>
    %9 = arith.subf %8, %7 : vector<128x128xf32>
    %10 = math.exp %9 : vector<128x128xf32>
    %cst_5 = arith.constant 1.000000e+00 : f32
    %11 = vector.broadcast %cst_5 : f32 to vector<128x128xf32>
    %12 = arith.addf %11, %10 : vector<128x128xf32>
    %13 = math.log %12 : vector<128x128xf32>
    %14 = arith.addf %6, %13 : vector<128x128xf32>
    %c0_6 = arith.constant 0 : index
    %c0_7 = arith.constant 0 : index
    %15 = vector.load %arg3[%c0_6, %c0_7] : memref<128x128xf32, #tpu.memory_space<vmem>>, vector<128x128xf32>
    %16 = arith.mulf %14, %3 : vector<128x128xf32>
    %17 = arith.addf %15, %16 : vector<128x128xf32>
    %c0_8 = arith.constant 0 : index
    %c0_9 = arith.constant 0 : index
    %18 = vector.load %arg9[%c0_8, %c0_9] : memref<8x128xf32, #tpu.memory_space<vmem>>, vector<8x128xf32>
    %c0_10 = arith.constant 0 : index
    %c0_11 = arith.constant 0 : index
    %19 = vector.load %arg2[%c0_10, %c0_11] : memref<8x128xf32, #tpu.memory_space<vmem>>, vector<8x128xf32>
    %cst_12 = arith.constant dense<0.000000e+00> : vector<8x128xf32>
    %20 = tpu.matmul %19, %17, %cst_12 {dimension_numbers = #tpu.dot_dimension_numbers<[1], [1], [0], [0], [0, 0, 1, 0], [], []>} : vector<8x128xf32>, vector<128x128xf32>, vector<8x128xf32> -> vector<8x128xf32>
    %21 = arith.addf %18, %20 : vector<8x128xf32>
    %c0_13 = arith.constant 0 : index
    %c0_14 = arith.constant 0 : index
    %22 = vector.load %arg9[%c0_13, %c0_14] : memref<8x128xf32, #tpu.memory_space<vmem>>, vector<8x128xf32>
    tpu.vector_store %arg9[%c0_13, %c0_14], %21 {strides = array<i32>} : memref<8x128xf32, #tpu.memory_space<vmem>>, vector<8x128xf32>,
    %c0_15 = arith.constant 0 : index
    %c0_16 = arith.constant 0 : index
    %23 = vector.load %arg11[%c0_15, %c0_16] : memref<1x128xf32, #tpu.memory_space<vmem>>, vector<1x128xf32>
    %24 = math.log %14 : vector<128x128xf32>
    %cst_17 = arith.constant 0.000000e+00 : f32
    %25 = vector.broadcast %cst_17 : f32 to vector<128x128xf32>
    %26 = arith.subf %25, %24 : vector<128x128xf32>
    %27 = arith.mulf %3, %3 : vector<128x128xf32>
    %cst_18 = arith.constant 5.000000e-01 : f32
    %28 = vector.broadcast %cst_18 : f32 to vector<128x128xf32>
    %29 = arith.mulf %28, %27 : vector<128x128xf32>
    %30 = arith.subf %26, %29 : vector<128x128xf32>
    %cst_19 = arith.constant dense<0.000000e+00> : vector<128xf32>
    %31 = vector.multi_reduction <add>, %30, %cst_19 [0] : vector<128x128xf32> to vector<128xf32>
    %32 = vector.shape_cast %31 : vector<128xf32> to vector<1x128xf32>
    %33 = arith.addf %23, %32 : vector<1x128xf32>
    %c0_20 = arith.constant 0 : index
    %c0_21 = arith.constant 0 : index
    %34 = vector.load %arg11[%c0_20, %c0_21] : memref<1x128xf32, #tpu.memory_space<vmem>>, vector<1x128xf32>
    tpu.vector_store %arg11[%c0_20, %c0_21], %33 {strides = array<i32>} : memref<1x128xf32, #tpu.memory_space<vmem>>, vector<1x128xf32>,
    %c0_22 = arith.constant 0 : index
    %c0_23 = arith.constant 0 : index
    %35 = vector.load %arg12[%c0_22, %c0_23] : memref<1x128xf32, #tpu.memory_space<vmem>>, vector<1x128xf32>
    %36 = arith.mulf %17, %17 : vector<128x128xf32>
    %cst_24 = arith.constant -124999.5 : f32
    %37 = vector.broadcast %cst_24 : f32 to vector<128x128xf32>
    %38 = arith.mulf %36, %37 : vector<128x128xf32>
    %cst_25 = arith.constant 6.21460819 : f32
    %39 = vector.broadcast %cst_25 : f32 to vector<128x128xf32>
    %40 = arith.addf %38, %39 : vector<128x128xf32>
    %cst_26 = arith.constant -5.000000e-01 : f32
    %41 = vector.broadcast %cst_26 : f32 to vector<128x128xf32>
    %42 = arith.mulf %41, %36 : vector<128x128xf32>
    %cst_27 = arith.constant 0.000000e+00 : f32
    %43 = vector.broadcast %cst_27 : f32 to vector<128x128xf32>
    %44 = arith.maximumf %40, %43 : vector<128x128xf32>
    %45 = arith.addf %42, %44 : vector<128x128xf32>
    %46 = math.absf %40 : vector<128x128xf32>
    %cst_28 = arith.constant 0.000000e+00 : f32
    %47 = vector.broadcast %cst_28 : f32 to vector<128x128xf32>
    %48 = arith.subf %47, %46 : vector<128x128xf32>
    %49 = math.exp %48 : vector<128x128xf32>
    %cst_29 = arith.constant 1.000000e+00 : f32
    %50 = vector.broadcast %cst_29 : f32 to vector<128x128xf32>
    %51 = arith.addf %50, %49 : vector<128x128xf32>
    %52 = math.log %51 : vector<128x128xf32>
    %53 = arith.addf %45, %52 : vector<128x128xf32>
    %cst_30 = arith.constant dense<0.000000e+00> : vector<128xf32>
    %54 = vector.multi_reduction <add>, %53, %cst_30 [0] : vector<128x128xf32> to vector<128xf32>
    %55 = vector.shape_cast %54 : vector<128xf32> to vector<1x128xf32>
    %56 = arith.addf %35, %55 : vector<1x128xf32>
    %c0_31 = arith.constant 0 : index
    %c0_32 = arith.constant 0 : index
    %57 = vector.load %arg12[%c0_31, %c0_32] : memref<1x128xf32, #tpu.memory_space<vmem>>, vector<1x128xf32>
    tpu.vector_store %arg12[%c0_31, %c0_32], %56 {strides = array<i32>} : memref<1x128xf32, #tpu.memory_space<vmem>>, vector<1x128xf32>,
    %c1_i32 = arith.constant 1 : i32
    %58 = arith.cmpi eq, %arg1, %c1_i32 : i32
    %59 = arith.extui %58 : i1 to i32
    %c0_i32_33 = arith.constant 0 : i32
    %60 = arith.cmpi ne, %59, %c0_i32_33 : i32
    scf.if %60 {
      %c0_34 = arith.constant 0 : index
      %c0_35 = arith.constant 0 : index
      %61 = vector.load %arg8[%c0_34, %c0_35] : memref<1x128xf32, #tpu.memory_space<vmem>>, vector<1x128xf32>
      %c0_36 = arith.constant 0 : index
      %c0_37 = arith.constant 0 : index
      %62 = vector.load %arg7[%c0_36, %c0_37] : memref<1x128xf32, #tpu.memory_space<vmem>>, vector<1x128xf32>
      %cst_38 = arith.constant 0.000000e+00 : f32
      %63 = vector.broadcast %cst_38 : f32 to vector<1x128xf32>
      %64 = arith.maximumf %62, %63 : vector<1x128xf32>
      %65 = math.absf %62 : vector<1x128xf32>
      %cst_39 = arith.constant 0.000000e+00 : f32
      %66 = vector.broadcast %cst_39 : f32 to vector<1x128xf32>
      %67 = arith.subf %66, %65 : vector<1x128xf32>
      %68 = math.exp %67 : vector<1x128xf32>
      %cst_40 = arith.constant 1.000000e+00 : f32
      %69 = vector.broadcast %cst_40 : f32 to vector<1x128xf32>
      %70 = arith.addf %69, %68 : vector<1x128xf32>
      %71 = math.log %70 : vector<1x128xf32>
      %72 = arith.addf %64, %71 : vector<1x128xf32>
      %c0_41 = arith.constant 0 : index
      %c0_42 = arith.constant 0 : index
      %73 = vector.load %arg6[%c0_41, %c0_42] : memref<1x128xf32, #tpu.memory_space<vmem>>, vector<1x128xf32>
      %74 = arith.mulf %72, %61 : vector<1x128xf32>
      %75 = arith.addf %73, %74 : vector<1x128xf32>
      %c0_43 = arith.constant 0 : index
      %c0_44 = arith.constant 0 : index
      %76 = vector.load %arg9[%c0_43, %c0_44] : memref<8x128xf32, #tpu.memory_space<vmem>>, vector<8x128xf32>
      %77 = vector.broadcast %75 : vector<1x128xf32> to vector<8x128xf32>
      %78 = arith.addf %76, %77 : vector<8x128xf32>
      %c0_45 = arith.constant 0 : index
      %c0_46 = arith.constant 0 : index
      %79 = vector.load %arg9[%c0_45, %c0_46] : memref<8x128xf32, #tpu.memory_space<vmem>>, vector<8x128xf32>
      tpu.vector_store %arg9[%c0_45, %c0_46], %78 {strides = array<i32>} : memref<8x128xf32, #tpu.memory_space<vmem>>, vector<8x128xf32>,
      %c0_47 = arith.constant 0 : index
      %c0_48 = arith.constant 0 : index
      %80 = vector.load %arg11[%c0_47, %c0_48] : memref<1x128xf32, #tpu.memory_space<vmem>>, vector<1x128xf32>
      %cst_49 = arith.constant dense<0.000000e+00> : vector<1xf32>
      %81 = vector.multi_reduction <add>, %80, %cst_49 [1] : vector<1x128xf32> to vector<1xf32>
      %82 = vector.shape_cast %81 : vector<1xf32> to vector<1x1xf32>
      %c0_50 = arith.constant 0 : index
      %c0_51 = arith.constant 0 : index
      %83 = vector.load %arg12[%c0_50, %c0_51] : memref<1x128xf32, #tpu.memory_space<vmem>>, vector<1x128xf32>
      %cst_52 = arith.constant dense<0.000000e+00> : vector<1xf32>
      %84 = vector.multi_reduction <add>, %83, %cst_52 [1] : vector<1x128xf32> to vector<1xf32>
      %85 = vector.shape_cast %84 : vector<1xf32> to vector<1x1xf32>
      %86 = math.log %72 : vector<1x128xf32>
      %cst_53 = arith.constant 0.000000e+00 : f32
      %87 = vector.broadcast %cst_53 : f32 to vector<1x128xf32>
      %88 = arith.subf %87, %86 : vector<1x128xf32>
      %89 = arith.mulf %61, %61 : vector<1x128xf32>
      %cst_54 = arith.constant 5.000000e-01 : f32
      %90 = vector.broadcast %cst_54 : f32 to vector<1x128xf32>
      %91 = arith.mulf %90, %89 : vector<1x128xf32>
      %92 = arith.subf %88, %91 : vector<1x128xf32>
      %93 = vector.shape_cast %92 : vector<1x128xf32> to vector<1x1x128xf32>
      %cst_55 = arith.constant dense<0.000000e+00> : vector<1xf32>
      %94 = vector.multi_reduction <add>, %93, %cst_55 [1, 2] : vector<1x1x128xf32> to vector<1xf32>
      %95 = vector.shape_cast %94 : vector<1xf32> to vector<1x1x1xf32>
      %96 = vector.extract %95[0, 0, 0] : f32 from vector<1x1x1xf32>
      %97 = vector.broadcast %96 : f32 to vector<1x1xf32>
      %98 = arith.mulf %75, %75 : vector<1x128xf32>
      %cst_56 = arith.constant -124999.5 : f32
      %99 = vector.broadcast %cst_56 : f32 to vector<1x128xf32>
      %100 = arith.mulf %98, %99 : vector<1x128xf32>
      %cst_57 = arith.constant 6.21460819 : f32
      %101 = vector.broadcast %cst_57 : f32 to vector<1x128xf32>
      %102 = arith.addf %100, %101 : vector<1x128xf32>
      %cst_58 = arith.constant -5.000000e-01 : f32
      %103 = vector.broadcast %cst_58 : f32 to vector<1x128xf32>
      %104 = arith.mulf %103, %98 : vector<1x128xf32>
      %cst_59 = arith.constant 0.000000e+00 : f32
      %105 = vector.broadcast %cst_59 : f32 to vector<1x128xf32>
      %106 = arith.maximumf %102, %105 : vector<1x128xf32>
      %107 = arith.addf %104, %106 : vector<1x128xf32>
      %108 = math.absf %102 : vector<1x128xf32>
      %cst_60 = arith.constant 0.000000e+00 : f32
      %109 = vector.broadcast %cst_60 : f32 to vector<1x128xf32>
      %110 = arith.subf %109, %108 : vector<1x128xf32>
      %111 = math.exp %110 : vector<1x128xf32>
      %cst_61 = arith.constant 1.000000e+00 : f32
      %112 = vector.broadcast %cst_61 : f32 to vector<1x128xf32>
      %113 = arith.addf %112, %111 : vector<1x128xf32>
      %114 = math.log %113 : vector<1x128xf32>
      %115 = arith.addf %107, %114 : vector<1x128xf32>
      %116 = vector.shape_cast %115 : vector<1x128xf32> to vector<1x1x128xf32>
      %cst_62 = arith.constant dense<0.000000e+00> : vector<1xf32>
      %117 = vector.multi_reduction <add>, %116, %cst_62 [1, 2] : vector<1x1x128xf32> to vector<1xf32>
      %118 = vector.shape_cast %117 : vector<1xf32> to vector<1x1x1xf32>
      %119 = vector.extract %118[0, 0, 0] : f32 from vector<1x1x1xf32>
      %120 = vector.broadcast %119 : f32 to vector<1x1xf32>
      %121 = tpu.iota {dimensions = array<i32: 1>} : vector<8x128xi32>
      %c0_i32_63 = arith.constant 0 : i32
      %122 = vector.broadcast %c0_i32_63 : i32 to vector<8x128xi32>
      %123 = arith.cmpi eq, %121, %122 : vector<8x128xi32>
      %cst_64 = arith.constant 0.000000e+00 : f32
      %124 = vector.shape_cast %82 : vector<1x1xf32> to vector<1x1xf32>
      %125 = vector.broadcast %124 : vector<1x1xf32> to vector<8x128xf32>
      %126 = vector.broadcast %cst_64 : f32 to vector<8x128xf32>
      %127 = arith.select %123, %125, %126 : vector<8x128xi1>, vector<8x128xf32>
      %c1_i32_65 = arith.constant 1 : i32
      %128 = vector.broadcast %c1_i32_65 : i32 to vector<8x128xi32>
      %129 = arith.cmpi eq, %121, %128 : vector<8x128xi32>
      %cst_66 = arith.constant 0.000000e+00 : f32
      %130 = vector.shape_cast %85 : vector<1x1xf32> to vector<1x1xf32>
      %131 = vector.broadcast %130 : vector<1x1xf32> to vector<8x128xf32>
      %132 = vector.broadcast %cst_66 : f32 to vector<8x128xf32>
      %133 = arith.select %129, %131, %132 : vector<8x128xi1>, vector<8x128xf32>
      %134 = arith.addf %127, %133 : vector<8x128xf32>
      %c2_i32 = arith.constant 2 : i32
      %135 = vector.broadcast %c2_i32 : i32 to vector<8x128xi32>
      %136 = arith.cmpi eq, %121, %135 : vector<8x128xi32>
      %cst_67 = arith.constant 0.000000e+00 : f32
      %137 = vector.shape_cast %97 : vector<1x1xf32> to vector<1x1xf32>
      %138 = vector.broadcast %137 : vector<1x1xf32> to vector<8x128xf32>
      %139 = vector.broadcast %cst_67 : f32 to vector<8x128xf32>
      %140 = arith.select %136, %138, %139 : vector<8x128xi1>, vector<8x128xf32>
      %141 = arith.addf %134, %140 : vector<8x128xf32>
      %c3_i32 = arith.constant 3 : i32
      %142 = vector.broadcast %c3_i32 : i32 to vector<8x128xi32>
      %143 = arith.cmpi eq, %121, %142 : vector<8x128xi32>
      %cst_68 = arith.constant 0.000000e+00 : f32
      %144 = vector.shape_cast %120 : vector<1x1xf32> to vector<1x1xf32>
      %145 = vector.broadcast %144 : vector<1x1xf32> to vector<8x128xf32>
      %146 = vector.broadcast %cst_68 : f32 to vector<8x128xf32>
      %147 = arith.select %143, %145, %146 : vector<8x128xi1>, vector<8x128xf32>
      %148 = arith.addf %141, %147 : vector<8x128xf32>
      %c0_69 = arith.constant 0 : index
      %c0_70 = arith.constant 0 : index
      %149 = vector.load %arg10[%c0_69, %c0_70] : memref<8x128xf32, #tpu.memory_space<vmem>>, vector<8x128xf32>
      tpu.vector_store %arg10[%c0_69, %c0_70], %148 {strides = array<i32>} : memref<8x128xf32, #tpu.memory_space<vmem>>, vector<8x128xf32>,
    } else {
    }
    return
  }
  func.func @transform_0(%arg0: i32, %arg1: i32) -> (i32, i32) {
    %c0_i32 = arith.constant 0 : i32
    %c0_i32_0 = arith.constant 0 : i32
    return %c0_i32, %arg1 : i32, i32
  }
  func.func @transform_1(%arg0: i32, %arg1: i32) -> (i32, i32) {
    %c0_i32 = arith.constant 0 : i32
    return %arg0, %arg1 : i32, i32
  }
  func.func @transform_2(%arg0: i32, %arg1: i32) -> (i32, i32) {
    %c0_i32 = arith.constant 0 : i32
    return %arg0, %arg1 : i32, i32
  }
  func.func @transform_3(%arg0: i32, %arg1: i32) -> (i32, i32) {
    %c0_i32 = arith.constant 0 : i32
    return %arg0, %arg1 : i32, i32
  }
  func.func @transform_4(%arg0: i32, %arg1: i32) -> (i32, i32) {
    %c0_i32 = arith.constant 0 : i32
    %c0_i32_0 = arith.constant 0 : i32
    return %c0_i32, %arg0 : i32, i32
  }
  func.func @transform_5(%arg0: i32, %arg1: i32) -> (i32, i32) {
    %c0_i32 = arith.constant 0 : i32
    %c0_i32_0 = arith.constant 0 : i32
    return %c0_i32, %arg0 : i32, i32
  }
  func.func @transform_6(%arg0: i32, %arg1: i32) -> (i32, i32) {
    %c0_i32 = arith.constant 0 : i32
    %c0_i32_0 = arith.constant 0 : i32
    return %c0_i32, %arg0 : i32, i32
  }
  func.func @transform_7(%arg0: i32, %arg1: i32) -> (i32, i32) {
    %c0_i32 = arith.constant 0 : i32
    %c0_i32_0 = arith.constant 0 : i32
    return %c0_i32, %arg0 : i32, i32
  }
  func.func @transform_8(%arg0: i32, %arg1: i32) -> (i32, i32) {
    %c0_i32 = arith.constant 0 : i32
    %c0_i32_0 = arith.constant 0 : i32
    return %arg0, %c0_i32 : i32, i32
  }
}

</mosaic_0001>

<bundles_post_ra>
// kernel: tpu_custom_call.1
= control target key start
LH: loop header
LB: loop body
LE: loop exit
PB: predicated region body
PF: predicated region fallthrough
CT: control target
= control target key end

     0   :  { %s3124_s0 = inlined_call_operand.hbm [shape: f32[8,256], index: 0, kind: input, shape index: {}]   ;;  %s3125_s1 = inlined_call_operand.hbm [shape: f32[384,256], index: 1, kind: input, shape index: {}]   ;;  %s3126_s2 = inlined_call_operand.hbm [shape: f32[384,256], index: 2, kind: input, shape index: {}]   ;;  %s3127_s3 = inlined_call_operand.hbm [shape: f32[384,256], index: 3, kind: input, shape index: {}]   ;;  %s3128_s4 = inlined_call_operand.vmem [shape: f32[1,384], index: 4, kind: input, shape index: {}]   ;;  %s3129_s5 = inlined_call_operand.hbm [shape: f32[1,384], index: 5, kind: input, shape index: {}]   ;;  %s3130_s6 = inlined_call_operand.hbm [shape: f32[1,384], index: 6, kind: input, shape index: {}]   ;;  %s3131_s7 = inlined_call_operand.hbm [shape: f32[8,384], index: 7, kind: output, shape index: {0}]   ;;  %s3132_s8 = inlined_call_operand.hbm [shape: f32[24,128], index: 8, kind: output, shape index: {1}]  }
   0x1   :  { %3147 = sst [smem:[#allocation36_spill]] %s3124_s0 }
   0x2   :  { %3148 = sst [smem:[#allocation37_spill]] %s3125_s1 }
   0x3   :  { %3149 = sst [smem:[#allocation38_spill]] %s3126_s2 }
   0x4   :  { %3150 = sst [smem:[#allocation39_spill]] %s3127_s3 }
   0x5   :  { %3151 = sst [smem:[#allocation40_spill]] %s3128_s4 }
   0x6   :  { %3152 = sst [smem:[#allocation41_spill]] %s3129_s5 }
   0x7   :  { %3153 = sst [smem:[#allocation42_spill]] %s3130_s6 }
   0x8   :  { %3154 = sst [smem:[#allocation43_spill]] %s3131_s7 }
   0x9   :  { %3155 = sst [smem:[#allocation44_spill]] %s3132_s8 }
   0xa   :  { %14 = vsyncpa [#allocation5], 0 }
   0xb   :  { %16 = vsyncpa [#allocation5 + $0x1], 0 }
   0xc   :  { %17 = vsyncpa [#allocation8], 0 }
   0xd   :  { %19 = vsyncpa [#allocation8 + $0x1], 0 }
   0xe   :  { %20 = vsyncpa [#allocation11], 0 }
   0xf   :  { %22 = vsyncpa [#allocation11 + $0x1], 0 }
  0x10   :  { %23 = vsyncpa [#allocation14], 0 }
  0x11   :  { %25 = vsyncpa [#allocation14 + $0x1], 0 }
  0x12   :  { %26 = vsyncpa [#allocation6], 0 }
  0x13   :  { %28 = vsyncpa [#allocation6 + $0x1], 0 }
  0x14   :  { %29 = vsyncpa [#allocation17], 0 }
  0x15   :  { %31 = vsyncpa [#allocation17 + $0x1], 0  ;;  %s2339_s27 = smov 0   ;;  %s2341_s28 = smov 0  }
  0x16   :  { %s2343_s29 = smov 0   ;;  %s2345_s30 = smov 0  }
  0x17   :  { %s2347_s9 = smov 0   ;;  %s2349_s10 = smov 0  }
  0x18   :  { %s2351_s11 = smov 0   ;;  %s2353_s12 = smov 0  }
  0x19   :  { %s2355_s13 = smov 0   ;;  %s2357_s14 = smov 0  }
  0x1a   :  { %s2359_s15 = smov 0   ;;  %s2361_s16 = smov 0  }
  0x1b   :  { %s2363_s17 = smov 0   ;;  %s2365_s18 = smov 0  }
  0x1c LB: > { %3156 = sst [smem:[#allocation25_spill]] %s2264_s12  ;;  %p64_p0 = scmp.eq.s32.totalorder %s2288_s18, 0  ;;  %s2288_s18 = sphi %s2365_s18, %s37_s18   ;;  %s2284_s17 = sphi %s2363_s17, %s3212_s17   ;;  %s2280_s16 = sphi %s2361_s16, %s3203_s16   ;;  %s2276_s15 = sphi %s2359_s15, %s3211_s15   ;;  %s2272_s14 = sphi %s2357_s14, %s3202_s14   ;;  %s2268_s13 = sphi %s2355_s13, %s3201_s13   ;;  %s2264_s12 = sphi %s2353_s12, %s3200_s12   ;;  %s2260_s11 = sphi %s2351_s11, %s3199_s11   ;;  %s2256_s10 = sphi %s2349_s10, %s3210_s10   ;;  %s2252_s9 = sphi %s2347_s9, %s3209_s9   ;;  %s2248_s30 = sphi %s2345_s30, %s3208_s30   ;;  %s2244_s29 = sphi %s2343_s29, %s3207_s29   ;;  %s2240_s28 = sphi %s2341_s28, %s3206_s28   ;;  %s2236_s27 = sphi %s2339_s27, %s3205_s27  }
  0x1d   : > { %3157 = sst [smem:[#allocation26_spill]] %s2268_s13  ;;  %p91_p1 = scmp.ne.s32.totalorder %s2256_s10, %s2252_s9 }
  0x1e   : > { %3158 = sst [smem:[#allocation27_spill]] %s2272_s14  ;;  %p97_p2 = scmp.ne.s32.totalorder %s2252_s9, %s2248_s30 }
  0x1f   : > { %3159 = sst [smem:[#allocation28_spill]] %s2276_s15  ;;  %p1626_p3 = scmp.lt.s32.totalorder %s2288_s18, 6 }
  0x20   : > { %3160 = sst [smem:[#allocation29_spill]] %s2280_s16  ;;  %p93_p4 = por %p91_p1, %p64_p0 }
  0x21   : > { %s326_s20 = sand.u32 1, %s2288_s18   ;;  %s328_s21 = sand.u32 1, %s2256_s10  }
  0x22   : > { %s2420_s22 = sshll.u32 %s328_s21, 7  ;;  %s1577_s23 = sshll.u32 %s2284_s17, 5 }
  0x23   : > { %s335_s24 = sadd.s32 %s2280_s16, %s1577_s23  ;;  %s330_s26 = scalar_lea.vmem [#allocation7], %s2420_s22 }
  0x24   : > { %s2424_s25 = sshll.u32 %s335_s24, 3  ;;  %s340_s19 = sshll.u32 %s330_s26, 4  ;;  %s341_s19 = int_to_ptr.vmem [resolvable:$true] %s340_s19 }
  0x25   : > { %s3161_s1 = sld [smem:[#allocation37_spill]]  ;;  %p2433_p5 = pnand %p1626_p3, %p93_p4 }
  0x26   : > { %p1562_p6 = scmp.ge.s32.totalorder %s2288_s18, 1  ;;  %s2438_s23 = scalar_lea.sflag [#allocation8], %s326_s20 }
  0x27   : > { %s3136_s24 = smov 256   ;;  %s3137_s7 = smov 128  }
  0x28   : > { %s3138_s8 = smov 8   ;;  %p436_p7 = scmp.lt.s32.totalorder %s2288_s18, 7 }
  0x29   : > { %s3163_s3 = sld [smem:[#allocation39_spill]]  ;;  %s378_s5 = scalar_lea.vmem [#allocation10], %s2420_s22 }
  0x2a   : > { %p2451_p8 = pnand %p1562_p6, %p436_p7  ;;  %s49_s26 = sadd.s32 1, %s2284_s17 }
  0x2b   : > { %s337_s14 = scalar_lea.hbm %s3161_s1, %s2424_s25  ;;  %p63_p10 = scmp.ne.s32.totalorder %s2268_s13, %s2264_s12 }
  0x2c   : > { %s338_s4 = sshll.u32 %s337_s14, 4  ;;  %s2465_s14 = sadd.s32 4294967295, %s2288_s18   ;;  %s339_s4 = int_to_ptr.hbm [resolvable:$true] %s338_s4 }
  0x2d   : > { %1606 = dma.hbm_to_vmem [thread:$0]  (!%p2433_p5), %s339_s4, 2048, %s341_s19, %s2438_s23, %s3136_s24, %s3137_s7, %s3138_s8  }
  0x2e   : > { %s3164_s15 = scalar_select %p2451_p8, 1, 0 }
  0x2f   : > { %s385_s1 = scalar_lea.hbm %s3163_s3, %s2424_s25  ;;  %s388_s4 = sshll.u32 %s378_s5, 4  ;;  %s389_s4 = int_to_ptr.vmem [resolvable:$true] %s388_s4 }
  0x30   : > { %3165 = sst [smem:[#allocation30_spill]] %s3164_s15  ;;  %s386_s6 = sshll.u32 %s385_s1, 4  ;;  %s387_s6 = int_to_ptr.hbm [resolvable:$true] %s386_s6 }
  0x31   : > { %s2456_s19 = scalar_lea.sflag [#allocation11], %s326_s20  ;;  %s46_s1 = sadd.s32 1, %s2280_s16 }
  0x32   : > { %1612 = dma.hbm_to_vmem [thread:$0]  (!%p2433_p5), %s387_s6, 2048, %s389_s4, %s2456_s19, %s3136_s24, %s3137_s7, %s3138_s8  }
  0x33   : > { %p47_p9 = scmp.ge.s32.totalorder %s46_s1, 2  ;;  %s56_s5 = sadd.s32 1, %s2268_s13 }
  0x34   : > { %p69_p11 = scmp.ne.s32.totalorder %s2264_s12, %s2260_s11  ;;  %p2481_p12 = por %p64_p0, %p63_p10 }
  0x35   : > { %s3214_s1 = smov (%p47_p9, %s46_s1), 0  ;;  %s3216_s26 = smov (!%p47_p9, %s49_s26), %s2284_s17 }
  0x36   : > { %3166 = sst [smem:[#allocation31_spill]] %s3214_s1  ;;  %s53_s6 = ssub.s32 %s2280_s16, %s3214_s1 }
  0x37   : > { %p51_p13 = scmp.ge.s32.totalorder %s3216_s26, 3  ;;  %p54_p1 = scmp.eq.s32.totalorder %s53_s6, 0 }
  0x38   : > { %p70_p4 = scmp.eq.s32.totalorder %s2465_s14, 0  ;;  %s307_s4 = sand.u32 1, %s2268_s13  }
  0x39   : > { %s3218_s26 = smov (%p51_p13, %s3216_s26), 0  ;;  %s1548_s1 = sshll.u32 %s307_s4, 3 }
  0x3a   : > { %3168 = sst [smem:[#allocation32_spill]] %s3218_s26  ;;  %p2494_p6 = por %p70_p4, %p69_p11 }
  0x3b   : > { %s2490_s11 = scalar_select %p54_p1, %s2268_s13, %s56_s5  }
  0x3c   : > { %s3170_s24 = scalar_select %p2494_p6, 1, 0 }
  0x3d   : > { %3169 = sst [smem:[#allocation33_spill]] %s2490_s11  ;;  %s79_s7 = ssub.s32 %s2284_s17, %s3218_s26 }
  0x3e   : > { %3171 = sst [smem:[#allocation34_spill]] %s3170_s24  ;;  %s81_s8 = sor.u32 %s79_s7, %s53_s6 }
  0x3f   : > { %p2505_p7 = por %p97_p2, %p70_p4  ;;  %p82_p9 = scmp.eq.s32.totalorder %s81_s8, 0 }
  0x40   : > { %s1549_s12 = sshll.u32 %s2280_s16, 3  ;;  %s3173_s5 = sadd.s32 1, %s2256_s10 }
  0x41   : > { %s2513_s11 = scalar_select %p82_p9, %s2256_s10, %s3173_s5  }
  0x42   : > { %s3175_s0 = sld [smem:[#allocation36_spill]]  ;;  %s311_s26 = scalar_lea.vmem [#allocation4], %s1548_s1 }
  0x43   : > { %3174 = sst [smem:[#allocation35_spill]] %s2513_s11  ;;  %s319_s30 = sshll.u32 %s311_s26, 4  ;;  %s320_s30 = int_to_ptr.vmem [resolvable:$true] %s319_s30 }
  0x44   : > { %p1601_p2 = pnand %p1626_p3, %p2481_p12  ;;  %s3176_s2 = sld [smem:[#allocation38_spill]] }
  0x45   : > { %s354_s13 = scalar_lea.vmem [#allocation9], %s2420_s22  ;;  %s308_s1 = scalar_lea.sflag [#allocation5], %s307_s4 }
  0x46   : > { %s364_s15 = sshll.u32 %s354_s13, 4  ;;  %s3177_s26 = smov 8   ;;  %s365_s15 = int_to_ptr.vmem [resolvable:$true] %s364_s15 }
  0x47   : > { %s3178_s20 = smov 128   ;;  %s1545_s8 = sadd.s32 4294967294, %s2288_s18  }
  0x48   : > { %s315_s24 = scalar_lea.hbm %s3175_s0, %s1549_s12  ;;  %s3179_s0 = smov 256  }
  0x49   : > { %s317_s6 = sshll.u32 %s315_s24, 4  ;;  %p190_p10 = scmp.eq.s32.totalorder %s79_s7, 0  ;;  %s318_s6 = int_to_ptr.hbm [resolvable:$true] %s317_s6 }
  0x4a   : > { %s361_s12 = scalar_lea.hbm %s3176_s2, %s2424_s25  ;;  %s192_s5 = sadd.s32 1, %s2244_s29 }
  0x4b   : > { %s362_s24 = sshll.u32 %s361_s12, 4  ;;  %p199_p11 = scmp.ne.s32.totalorder %s2244_s29, %s2240_s28  ;;  %s363_s24 = int_to_ptr.hbm [resolvable:$true] %s362_s24 }
  0x4c   : > { %1603 = dma.hbm_to_vmem [thread:$0]  (!%p1601_p2), %s318_s6, 128, %s320_s30, %s308_s1  }
  0x4d   : > { %1609 = dma.hbm_to_vmem [thread:$0]  (!%p2433_p5), %s363_s24, 2048, %s365_s15, %s2438_s23, %s3179_s0, %s3178_s20, %s3177_s26  }
  0x4e   : > { %s2538_s22 = scalar_select %p190_p10, %s2244_s29, %s192_s5  }
  0x4f   : > { %p2542_p12 = por %p199_p11, %p64_p0  ;;  %p205_p13 = scmp.ne.s32.totalorder %s2240_s28, %s2236_s27 }
  0x50   : > { %p255_p1 = scmp.eq.s32.totalorder %s2465_s14, 5  ;;  %p261_p9 = scmp.eq.s32.totalorder %s1545_s8, 5 }
  0x51   : > { %p2551_p5 = por %p205_p13, %p70_p4  ;;  %s406_s21 = sand.u32 1, %s2244_s29  }
  0x52   : > { %p2556_p2 = por %p255_p1, %p199_p11  ;;  %p2560_p10 = por %p261_p9, %p205_p13 }
  0x53   : > { %s3184_s30 = sld [smem:[#allocation41_spill]]  ;;  %s407_s15 = scalar_lea.vmem [#allocation12], %s406_s21 }
  0x54   : > { %s414_s24 = sshll.u32 %s407_s15, 4  ;;  %p1613_p0 = pnand %p1626_p3, %p2542_p12  ;;  %s415_s24 = int_to_ptr.vmem [resolvable:$true] %s414_s24 }
  0x55   : > { %s3185_s20 = sld [smem:[#allocation42_spill]]  ;;  %s424_s2 = scalar_lea.vmem [#allocation13], %s406_s21 }
  0x56   : > { %s431_s16 = sshll.u32 %s424_s2, 4  ;;  %s422_s4 = scalar_lea.sflag [#allocation14], %s406_s21  ;;  %s432_s16 = int_to_ptr.vmem [resolvable:$true] %s431_s16 }
  0x59   : > { %s410_s12 = scalar_lea.hbm %s3184_s30, %s2284_s17  ;;  %s3187_s30 = sld [smem:[#allocation25_spill]] (!%p2451_p8) }
  0x5a   : > { %s412_s13 = sshll.u32 %s410_s12, 4  ;;  %440 = sbr.rel (%p2451_p8) target bundleno = 658 (0x292), region = 48  ;;  %s413_s13 = int_to_ptr.hbm [resolvable:$true] %s412_s13 }
  0x5b   : > { %s427_s8 = scalar_lea.hbm %s3185_s20, %s2284_s17 }
  0x5c   : > { %s429_s5 = sshll.u32 %s427_s8, 4  ;;  %s430_s5 = int_to_ptr.hbm [resolvable:$true] %s429_s5 }
  0x5d   : > { %1615 = dma.hbm_to_vmem [thread:$0]  (!%p1613_p0), %s413_s13, 16, %s415_s24, %s2456_s19  }
  0x5e   : > { %1618 = dma.hbm_to_vmem [thread:$0]  (!%p1613_p0), %s430_s5, 16, %s432_s16, %s422_s4  }
  0x5f   : > { %s442_s25 = sand.u32 1, %s3187_s30  }
  0x60   : > { %s2580_s15 = sshll.u32 %s442_s25, 3  ;;  %s443_s11 = scalar_lea.sflag [#allocation5], %s442_s25 }
  0x61   : > { %s446_s1 = scalar_lea.vmem [#allocation4], %s2580_s15 }
  0x62   : > { %2207 = dma.done.wait (%p2494_p6), %s443_s11, 128  }
  0x63   : > { %2209 = vsyncadd (%p2494_p6), %s443_s11, 4294967168  ;;  %s452_s2 = sand.u32 1, %s2465_s14   ;;  %s454_s16 = sand.u32 1, %s2252_s9  }
  0x64   : > { %s1564_s19 = sshll.u32 %s454_s16, 7  ;;  %s453_s21 = scalar_lea.sflag [#allocation8], %s452_s2 }
  0x65   : > { %s2589_s13 = scalar_lea.vmem [#allocation7], %s1564_s19 }
  0x66   : > { %2211 = dma.done.wait (%p2505_p7), %s453_s21, 4096  }
  0x67   : > { %2213 = vsyncadd (%p2505_p7), %s453_s21, 4294963200  ;;  %s2595_s24 = scalar_lea.vmem [#allocation9], %s1564_s19  ;;  %s473_s26 = scalar_lea.sflag [#allocation11], %s452_s2 }
  0x68   : > { %s2597_s20 = scalar_lea.vmem [#allocation10], %s1564_s19 }
  0x69   : > { %2215 = dma.done.wait (%p2505_p7), %s473_s26, 2048  }
  0x6a   : > { %2217 = vsyncadd (%p2505_p7), %s473_s26, 4294965248  ;;  %s2604_s14 = sand.u32 1, %s2240_s28  }
  0x6b   : > { %s485_s11 = scalar_lea.vmem [#allocation12], %s2604_s14 }
  0x6c   : > { %2219 = dma.done.wait (%p2551_p5), %s473_s26, 16  }
  0x6d   : > { %2221 = vsyncadd (%p2551_p5), %s473_s26, 4294967280  ;;  %s492_s8 = scalar_lea.sflag [#allocation14], %s2604_s14  ;;  %s494_s5 = scalar_lea.vmem [#allocation13], %s2604_s14 }
  0x6e   : > { %2223 = dma.done.wait (%p2551_p5), %s492_s8, 16  }
  0x6f   : > { %2225 = vsyncadd (%p2551_p5), %s492_s8, 4294967280  ;;  %s3189_s3 = sld [smem:[#allocation28_spill]]  ;;  %s1567_s4 = sshll.u32 %s2604_s14, 3 }
  0x70   : > { %s3190_s12 = sld [smem:[#allocation40_spill]]  ;;  %s2626_s2 = scalar_lea.vmem [#allocation15], %s1567_s4 }
  0x71   : > { %s2628_s16 = scalar_lea.vmem [#allocation16], %s1567_s4  ;;  %s3191_s19 = sld [smem:[#allocation27_spill]] }
  0x75   : > { %p562_p3 = scmp.lt.s32.totalorder %s3189_s3, 2 }
  0x77   : > { %s3220_s3 = smov (!%p562_p3, %s3189_s3), 2  ;;  %p1569_p8 = scmp.ne.s32.totalorder %s3191_s19, 0 }
  0x78   : > { %s564_s25 = scalar_lea.vmem %s3190_s12, %s3220_s3 }
  0x79   : > { %568 = sbr.rel (%p1569_p8) target bundleno = 130 (0x82), region = 76 }
  0x7e   : > { %v2293_v0 = vmov 0.0  }
  0x7f   : > { %569 = vst [vmem:[%s2626_s2] sm:$0xff] %v2293_v0 }
  0x80   : > { %570 = vst [vmem:[#allocation2] sm:$0x1] %v2293_v0 }
  0x81   : > { %571 = vst [vmem:[#allocation3] sm:$0x1] %v2293_v0 }
  0x82 PF: > { %v603_v1 = vld [vmem:[%s2595_s24 + $0x78] sm:$0xff]  ;;  %v2634_v3 = vld [vmem:[%s2595_s24 + $0x70] sm:$0xff]  ;;  %v2638_v5 = vld [vmem:[%s2595_s24 + $0x68] sm:$0xff]  ;;  %s3192_s0 = sld [smem:[#allocation27_spill]] }
  0x83   : > { %v635_v2 = vand.u32 2147483647, %v603_v1  ;;  %v634_v4 = vand.u32 2147483647, %v2634_v3  ;;  %v2641_v6 = vld [vmem:[%s2595_s24 + $0x60] sm:$0xff]  ;;  %v2645_v9 = vld [vmem:[%s2595_s24 + $0x58] sm:$0xff] }
  0x84   : > { %v633_v8 = vand.u32 2147483647, %v2638_v5  ;;  %v632_v11 = vand.u32 2147483647, %v2641_v6  ;;  %v631_v12 = vand.u32 2147483647, %v2645_v9 }
  0x85   : > { %v651_v7 = vsub.f32 0.0, %v635_v2  ;;  %v650_v10 = vsub.f32 0.0, %v634_v4  ;;  %v2650_v15 = vld [vmem:[%s2595_s24 + $0x50] sm:$0xff]  ;;  %v2654_v24 = vld [vmem:[%s2595_s24 + $0x48] sm:$0xff]  ;;  %v619_v39 = vmax.f32 %v603_v1, 0.0  ;;  %v618_v42 = vmax.f32 %v2634_v3, 0.0 }
  0x86   : > { %v649_v14 = vsub.f32 0.0, %v633_v8  ;;  %v648_v17 = vsub.f32 0.0, %v632_v11  ;;  %v647_v18 = vsub.f32 0.0, %v631_v12  ;;  %v630_v20 = vand.u32 2147483647, %v2650_v15  ;;  %v587_v47 = vld [vmem:[%s2597_s20 + $0x78] sm:$0xff] }
  0x87   : > { %v682_v13 = vmul.f32 1.442695, %v651_v7  ;;  %v680_v16 = vmul.f32 1.442695, %v650_v10  ;;  %v629_v26 = vand.u32 2147483647, %v2654_v24  ;;  %v884_v1 = vmul.f32 %v587_v47, %v587_v47 }
  0x88   : > { %v678_v19 = vmul.f32 1.442695, %v649_v14  ;;  %v676_v21 = vmul.f32 1.442695, %v648_v17  ;;  %v674_v22 = vmul.f32 1.442695, %v647_v18 }
  0x89   : > { %1744 = vpow2.f32 %v682_v13  ;;  %v646_v23 = vsub.f32 0.0, %v630_v20  ;;  %v645_v34 = vsub.f32 0.0, %v629_v26  ;;  %v617_v45 = vmax.f32 %v2638_v5, 0.0  ;;  %v586_v51 = vld [vmem:[%s2597_s20 + $0x70] sm:$0xff]  ;;  %v763_v53 = vld [vmem:[%s2589_s13 + $0x78] sm:$0xff]  ;;  %v585_v61 = vld [vmem:[%s2597_s20 + $0x68] sm:$0xff] }
  0x8a   : > { %1746 = vpow2.f32 %v680_v16  ;;  %v616_v55 = vmax.f32 %v2641_v6, 0.0  ;;  %v762_v59 = vld [vmem:[%s2589_s13 + $0x70] sm:$0xff]  ;;  %v2666_v63 = vld [vmem:[%s2595_s24 + $0x40] sm:$0xff]  ;;  %v883_v8 = vmul.f32 %v586_v51, %v586_v51  ;;  %v761_v10 = vld [vmem:[%s2589_s13 + $0x68] sm:$0xff]  ;;  %v900_v13 = vmul.f32 0.5, %v884_v1  ;;  %p1570_p4 = scmp.ne.s32.totalorder %s3192_s0, 1 }
  0x8b   : > { %1748 = vpow2.f32 %v678_v19  ;;  %v672_v25 = vmul.f32 1.442695, %v646_v23  ;;  %v670_v37 = vmul.f32 1.442695, %v645_v34  ;;  %v628_v7 = vand.u32 2147483647, %v2666_v63 }
  0x8c   : > { %1750 = vpow2.f32 %v676_v21  ;;  %v584_v11 = vld [vmem:[%s2597_s20 + $0x60] sm:$0xff]  ;;  %v882_v14 = vmul.f32 %v585_v61, %v585_v61  ;;  %v615_v17 = vmax.f32 %v2645_v9, 0.0 }
  0x8d   : > { %1752 = vpow2.f32 %v674_v22  ;;  %v644_v23 = vsub.f32 0.0, %v628_v7 }
  0x8e   : > { %1754 = vpow2.f32 %v672_v25 }
  0x8f   : > { %v1745_v27 = vpop.eup %1744 }
  0x90   : > { %v1747_v28 = vpop.eup %1746  ;;  %v699_v29 = vadd.f32 1.0, %v1745_v27 }
  0x91   : > { %v1749_v30 = vpop.eup %1748  ;;  %v698_v31 = vadd.f32 1.0, %v1747_v28  ;;  %v899_v28 = vmul.f32 0.5, %v883_v8  ;;  %v757_v8 = vld [vmem:[%s2589_s13 + $0x48] sm:$0xff] }
  0x92   : > { %v1751_v32 = vpop.eup %1750  ;;  %1756 = vlog2.f32 %v699_v29  ;;  %v697_v33 = vadd.f32 1.0, %v1749_v30  ;;  %v760_v29 = vld [vmem:[%s2589_s13 + $0x60] sm:$0xff]  ;;  %v881_v30 = vmul.f32 %v584_v11, %v584_v11 }
  0x93   : > { %1758 = vlog2.f32 %v698_v31  ;;  %v696_v35 = vadd.f32 1.0, %v1751_v32  ;;  %v1753_v36 = vpop.eup %1752  ;;  %v898_v32 = vmul.f32 0.5, %v882_v14 }
  0x94   : > { %1760 = vlog2.f32 %v697_v33  ;;  %v1755_v38 = vpop.eup %1754  ;;  %v695_v40 = vadd.f32 1.0, %v1753_v36 }
  0x95   : > { %1762 = vlog2.f32 %v696_v35  ;;  %v694_v62 = vadd.f32 1.0, %v1755_v38 }
  0x96   : > { %1764 = vpow2.f32 %v670_v37 }
  0x97   : > { %1766 = vlog2.f32 %v695_v40  ;;  %v2688_v40 = vld [vmem:[%s2595_s24 + $0x38] sm:$0xff] }
  0x98   : > { %v1757_v41 = vpop.eup %1756 }
  0x99   : > { %v1759_v43 = vpop.eup %1758  ;;  %v731_v44 = vmul.f32 0.6931472, %v1757_v41 }
  0x9a   : > { %v1761_v46 = vpop.eup %1760  ;;  %v729_v48 = vmul.f32 0.6931472, %v1759_v43  ;;  %v897_v43 = vmul.f32 0.5, %v881_v30 }
  0x9b   : > { %v1763_v49 = vpop.eup %1762  ;;  %v747_v50 = vadd.f32 %v731_v44, %v619_v39  ;;  %v727_v52 = vmul.f32 0.6931472, %v1761_v46  ;;  %v583_v39 = vld [vmem:[%s2597_s20 + $0x58] sm:$0xff]  ;;  %v668_v44 = vmul.f32 1.442695, %v644_v23 }
  0x9c   : > { %v746_v54 = vadd.f32 %v729_v48, %v618_v42  ;;  %v725_v58 = vmul.f32 0.6931472, %v1763_v49  ;;  %v1765_v2 = vpop.eup %1764  ;;  %v614_v48 = vmax.f32 %v2650_v15, 0.0 }
  0x9d   : > { %v779_v56 = vmul.f32 %v747_v50, %v587_v47  ;;  %1768 = vlog2.f32 %v747_v50  ;;  %v745_v57 = vadd.f32 %v727_v52, %v617_v45  ;;  %v1767_v3 = vpop.eup %1766  ;;  %v693_v19 = vadd.f32 1.0, %v1765_v2  ;;  %v2693_v45 = vld [vmem:[%s2595_s24 + $0x30] sm:$0xff]  ;;  %v759_v47 = vld [vmem:[%s2589_s13 + $0x58] sm:$0xff] }
  0x9e   : > { %v778_v60 = vmul.f32 %v746_v54, %v586_v51  ;;  %1770 = vlog2.f32 %v746_v54  ;;  %v744_v6 = vadd.f32 %v725_v58, %v616_v55  ;;  %v723_v18 = vmul.f32 0.6931472, %v1767_v3  ;;  %v581_v3 = vld [vmem:[%s2597_s20 + $0x48] sm:$0xff] }
  0x9f   : > { %v2668_v0 = vadd.f32 %v779_v56, %v763_v53  ;;  %1772 = vlog2.f32 %v745_v57  ;;  %v777_v5 = vmul.f32 %v745_v57, %v585_v61  ;;  %v627_v52 = vand.u32 2147483647, %v2688_v40  ;;  %v582_v57 = vld [vmem:[%s2597_s20 + $0x50] sm:$0xff] }
  0xa0   : > { %v2671_v4 = vadd.f32 %v778_v60, %v762_v59  ;;  %1774 = vlog2.f32 %v694_v62  ;;  %v776_v22 = vmul.f32 %v744_v6, %v584_v11  ;;  %v743_v35 = vadd.f32 %v723_v18, %v615_v17  ;;  %v758_v59 = vld [vmem:[%s2589_s13 + $0x50] sm:$0xff] }
  0xa1   : > { %798 = vmatpush.xpose.msra.mxu0 %v2668_v0  ;;  %1776 = vlog2.f32 %v744_v6  ;;  %v2678_v21 = vadd.f32 %v777_v5, %v761_v10  ;;  %v626_v53 = vand.u32 2147483647, %v2693_v45  ;;  %v613_v58 = vmax.f32 %v2654_v24, 0.0 }
  0xa2   : > { %1778 = vlog2.f32 %v693_v19  ;;  %v2684_v38 = vadd.f32 %v776_v22, %v760_v29  ;;  %v775_v51 = vmul.f32 %v743_v35, %v583_v39  ;;  %v643_v60 = vsub.f32 0.0, %v627_v52 }
  0xa3   : > { %v1769_v12 = vpop.eup %1768  ;;  %1780 = vpow2.f32 %v668_v44  ;;  %v642_v1 = vsub.f32 0.0, %v626_v53  ;;  %v880_v2 = vmul.f32 %v583_v39, %v583_v39  ;;  %v878_v19 = vmul.f32 %v581_v3, %v581_v3  ;;  %v756_v53 = vld [vmem:[%s2589_s13 + $0x40] sm:$0xff] }
  0xa4   : > { %v852_v16 = vmul.f32 0.6931472, %v1769_v12  ;;  %v1771_v20 = vpop.eup %1770  ;;  %v2704_v56 = vadd.f32 %v775_v51, %v759_v47  ;;  %1782 = vlog2.f32 %v743_v35  ;;  %v666_v10 = vmul.f32 1.442695, %v643_v60  ;;  %v2730_v47 = vld [vmem:[%s2595_s24 + $0x20] sm:$0xff] }
  0xa5   : > { %799 = vmatpush.xpose.msra.mxu0 %v2671_v4  ;;  %v1773_v25 = vpop.eup %1772  ;;  %v850_v27 = vmul.f32 0.6931472, %v1771_v20  ;;  %v664_v12 = vmul.f32 1.442695, %v642_v1  ;;  %v896_v14 = vmul.f32 0.5, %v880_v2  ;;  %v894_v30 = vmul.f32 0.5, %v878_v19 }
  0xa6   : > { %v868_v26 = vsub.f32 0.0, %v852_v16  ;;  %v848_v31 = vmul.f32 0.6931472, %v1773_v25  ;;  %v1775_v9 = vpop.eup %1774  ;;  %v879_v16 = vmul.f32 %v582_v57, %v582_v57  ;;  %v612_v39 = vmax.f32 %v2666_v63, 0.0  ;;  %v2736_v63 = vld [vmem:[%s2595_s24 + $0x18] sm:$0xff] }
  0xa7   : > { %v867_v34 = vsub.f32 0.0, %v850_v27  ;;  %v1777_v36 = vpop.eup %1776  ;;  %v721_v49 = vmul.f32 0.6931472, %v1775_v9  ;;  %v624_v52 = vand.u32 2147483647, %v2730_v47 }
  0xa8   : > { %v2681_v33 = vsub.f32 %v868_v26, %v900_v13  ;;  %v866_v37 = vsub.f32 0.0, %v848_v31  ;;  %v846_v42 = vmul.f32 0.6931472, %v1777_v36  ;;  %v1779_v54 = vpop.eup %1778  ;;  %v895_v26 = vmul.f32 0.5, %v879_v16  ;;  %v2721_v31 = vld [vmem:[%s2595_s24 + $0x28] sm:$0xff] }
  0xa9   : > { %800 = vmatpush.xpose.msra.mxu0 %v2678_v21  ;;  %v2690_v41 = vsub.f32 %v867_v34, %v899_v28  ;;  %v742_v15 = vadd.f32 %v721_v49, %v614_v48  ;;  %v719_v62 = vmul.f32 0.6931472, %v1779_v54  ;;  %v1781_v7 = vpop.eup %1780  ;;  %v580_v49 = vld [vmem:[%s2597_s20 + $0x40] sm:$0xff] }
  0xaa   : > { %v2695_v46 = vsub.f32 %v866_v37, %v898_v32  ;;  %v865_v50 = vsub.f32 0.0, %v846_v42  ;;  %v1783_v11 = vpop.eup %1782  ;;  %v692_v20 = vadd.f32 1.0, %v1781_v7  ;;  %v625_v37 = vand.u32 2147483647, %v2721_v31  ;;  %v579_v7 = vld [vmem:[%s2597_s20 + $0x38] sm:$0xff] }
  0xab   : > { %v774_v61 = vmul.f32 %v742_v15, %v582_v57  ;;  %1784 = vlog2.f32 %v742_v15  ;;  %v741_v6 = vadd.f32 %v719_v62, %v613_v58  ;;  %v844_v13 = vmul.f32 0.6931472, %v1783_v11  ;;  %v2749_v11 = vld [vmem:[%s2595_s24 + $0x10] sm:$0xff] }
  0xac   : > { %v2702_v55 = vsub.f32 %v865_v50, %v897_v43  ;;  %v641_v50 = vsub.f32 0.0, %v625_v37  ;;  %v640_v15 = vsub.f32 0.0, %v624_v52  ;;  %v611_v58 = vmax.f32 %v2688_v40, 0.0  ;;  %v2746_v40 = vld [vmem:[%s2597_s20 + $0x30] sm:$0xff] }
  0xad   : > { %801 = vmatpush.xpose.msra.mxu0 %v2684_v38  ;;  %v2711_v5 = vadd.f32 %v774_v61, %v758_v59  ;;  %v773_v24 = vmul.f32 %v741_v6, %v581_v3  ;;  %1786 = vlog2.f32 %v741_v6  ;;  %v864_v18 = vsub.f32 0.0, %v844_v13 }
  0xae   : > { %1788 = vpow2.f32 %v666_v10  ;;  %v662_v54 = vmul.f32 1.442695, %v641_v50  ;;  %v610_v61 = vmax.f32 %v2693_v45, 0.0  ;;  %v660_v2 = vmul.f32 1.442695, %v640_v15  ;;  %v2767_v50 = vld [vmem:[%s2595_s24 + $0x8] sm:$0xff] }
  0xaf   : > { %v2715_v17 = vadd.f32 %v773_v24, %v757_v8  ;;  %1790 = vpow2.f32 %v664_v12  ;;  %v2718_v23 = vsub.f32 %v864_v18, %v896_v14  ;;  %v623_v3 = vand.u32 2147483647, %v2736_v63  ;;  %v755_v24 = vld [vmem:[%s2589_s13 + $0x38] sm:$0xff]  ;;  %v2774_v15 = vld [vmem:[%s2595_s24] sm:$0xff] }
  0xb0   : > { %1792 = vlog2.f32 %v692_v20  ;;  %v877_v6 = vmul.f32 %v580_v49, %v580_v49  ;;  %v754_v20 = vld [vmem:[%s2589_s13 + $0x30] sm:$0xff]  ;;  %v609_v52 = vmax.f32 %v2721_v31, 0.0 }
  0xb1   : > { %802 = vmatpush.xpose.msra.mxu0 %v2704_v56  ;;  %v1785_v22 = vpop.eup %1784  ;;  %v639_v14 = vsub.f32 0.0, %v623_v3 }
  0xb2   : > { %v842_v25 = vmul.f32 0.6931472, %v1785_v22  ;;  %v893_v19 = vmul.f32 0.5, %v877_v6  ;;  %v620_v6 = vand.u32 2147483647, %v2774_v15 }
  0xb3   : > { %v1787_v27 = vpop.eup %1786 }
  0xb4   : > { %v863_v28 = vsub.f32 0.0, %v842_v25  ;;  %v840_v29 = vmul.f32 0.6931472, %v1787_v27  ;;  %v1789_v32 = vpop.eup %1788  ;;  %v622_v25 = vand.u32 2147483647, %v2749_v11 }
  0xb5   : > { %803 = vmatpush.xpose.msra.mxu0 %v2711_v5  ;;  %v1791_v35 = vpop.eup %1790  ;;  %v691_v42 = vadd.f32 1.0, %v1789_v32  ;;  %v658_v32 = vmul.f32 1.442695, %v639_v14 }
  0xb6   : > { %v2723_v9 = vsub.f32 %v863_v28, %v895_v26  ;;  %v862_v34 = vsub.f32 0.0, %v840_v29  ;;  %v1793_v43 = vpop.eup %1792  ;;  %v690_v44 = vadd.f32 1.0, %v1791_v35  ;;  %v876_v29 = vmul.f32 %v579_v7, %v579_v7 }
  0xb7   : > { %v717_v48 = vmul.f32 0.6931472, %v1793_v43  ;;  %1794 = vlog2.f32 %v691_v42  ;;  %v638_v37 = vsub.f32 0.0, %v622_v25 }
  0xb8   : > { %v2725_v36 = vsub.f32 %v862_v34, %v894_v30  ;;  %1796 = vlog2.f32 %v690_v44  ;;  %v892_v43 = vmul.f32 0.5, %v876_v29  ;;  %v606_v29 = vmax.f32 %v2749_v11, 0.0 }
  0xb9   : > { %804 = vmatpush.xpose.msra.mxu0 %v2715_v17  ;;  %v740_v51 = vadd.f32 %v717_v48, %v612_v39 }
  0xbb   : > { %v772_v57 = vmul.f32 %v740_v51, %v580_v49  ;;  %1798 = vlog2.f32 %v740_v51  ;;  %v656_v49 = vmul.f32 1.442695, %v638_v37  ;;  %v2803_v37 = vld [vmem:[%s2597_s20 + $0x18] sm:$0xff] }
  0xbc   : > { %1800 = vpow2.f32 %v662_v54  ;;  %v621_v54 = vand.u32 2147483647, %v2767_v50 }
  0xbd   : > { %v1795_v59 = vpop.eup %1794  ;;  %v2739_v60 = vadd.f32 %v772_v57, %v756_v53  ;;  %1802 = vpow2.f32 %v660_v2  ;;  %v753_v2 = vld [vmem:[%s2589_s13 + $0x28] sm:$0xff] }
  0xbe   : > { %v1797_v62 = vpop.eup %1796  ;;  %v715_v1 = vmul.f32 0.6931472, %v1795_v59  ;;  %v2777_v59 = vld [vmem:[%s2597_s20 + $0x28] sm:$0xff]  ;;  %v637_v31 = vsub.f32 0.0, %v621_v54  ;;  %v750_v54 = vld [vmem:[%s2589_s13 + $0x10] sm:$0xff] }
  0xbf   : > { %805 = vmatpush.xpose.msra.mxu0 %v2739_v60  ;;  %v713_v8 = vmul.f32 0.6931472, %v1797_v62  ;;  %v608_v62 = vmax.f32 %v2730_v47, 0.0 }
  0xc0   : > { %v739_v10 = vadd.f32 %v715_v1, %v611_v58 }
  0xc1   : > { %v2752_v12 = vadd.f32 %v713_v8, %v610_v61  ;;  %v1799_v45 = vpop.eup %1798 }
  0xc2   : > { %v771_v13 = vmul.f32 %v739_v10, %v579_v7  ;;  %1804 = vlog2.f32 %v739_v10  ;;  %v1801_v16 = vpop.eup %1800  ;;  %v838_v18 = vmul.f32 0.6931472, %v1799_v45  ;;  %v2787_v10 = vld [vmem:[%s2597_s20 + $0x20] sm:$0xff] }
  0xc3   : > { %v770_v22 = vmul.f32 %v2752_v12, %v2746_v40  ;;  %v689_v27 = vadd.f32 1.0, %v1801_v16  ;;  %v1803_v34 = vpop.eup %1802  ;;  %v752_v16 = vld [vmem:[%s2589_s13 + $0x20] sm:$0xff] }
  0xc4   : > { %v2758_v26 = vadd.f32 %v771_v13, %v755_v24  ;;  %v861_v28 = vsub.f32 0.0, %v838_v18  ;;  %v688_v44 = vadd.f32 1.0, %v1803_v34  ;;  %v636_v24 = vsub.f32 0.0, %v620_v6 }
  0xc5   : > { %v2761_v30 = vadd.f32 %v770_v22, %v754_v20  ;;  %1806 = vlog2.f32 %v689_v27  ;;  %v654_v18 = vmul.f32 1.442695, %v637_v31  ;;  %v607_v27 = vmax.f32 %v2736_v63, 0.0  ;;  %v751_v63 = vld [vmem:[%s2589_s13 + $0x18] sm:$0xff] }
  0xc6   : > { %806 = vmatpush.xpose.msra.mxu0 %v2758_v26  ;;  %v2763_v35 = vsub.f32 %v861_v28, %v893_v19  ;;  %1808 = vpow2.f32 %v658_v32  ;;  %v652_v20 = vmul.f32 1.442695, %v636_v24  ;;  %v2834_v24 = vmul.f32 %v2684_v38, %v2684_v38 }
  0xc7   : > { %1810 = vlog2.f32 %v688_v44 }
  0xc8   : > { %v1805_v39 = vpop.eup %1804  ;;  %1812 = vpow2.f32 %v656_v49  ;;  %v2812_v49 = vmul.f32 %v2671_v4, %v2671_v4  ;;  %v969_v38 = vmul.f32 -124999.5, %v2834_v24 }
  0xc9   : > { %v836_v42 = vmul.f32 0.6931472, %v1805_v39 }
  0xca   : > { %807 = vmatpush.xpose.msra.mxu0 %v2761_v30 }
  0xcb   : > { %v860_v48 = vsub.f32 0.0, %v836_v42  ;;  %v1807_v53 = vpop.eup %1806 }
  0xcc   : > { %v711_v57 = vmul.f32 0.6931472, %v1807_v53  ;;  %v1809_v58 = vpop.eup %1808 }
  0xcd   : > { %v2769_v51 = vsub.f32 %v860_v48, %v892_v43  ;;  %v1811_v1 = vpop.eup %1810  ;;  %v687_v3 = vadd.f32 1.0, %v1809_v58  ;;  %v574_v43 = vld [vmem:[%s2597_s20 + $0x10] sm:$0xff]  ;;  %v2808_v48 = vmul.f32 %v2668_v0, %v2668_v0  ;;  %v2823_v0 = vmul.f32 %v2678_v21, %v2678_v21 }
  0xce   : > { %v2779_v61 = vadd.f32 %v711_v57, %v609_v52  ;;  %v709_v8 = vmul.f32 0.6931472, %v1811_v1  ;;  %v1813_v45 = vpop.eup %1812 }
  0xcf   : > { %1814 = vlog2.f32 %v687_v3  ;;  %v686_v47 = vadd.f32 1.0, %v1813_v45  ;;  %v972_v1 = vmul.f32 -124999.5, %v2808_v48  ;;  %v970_v6 = vmul.f32 -124999.5, %v2823_v0 }
  0xd0   : > { %v769_v7 = vmul.f32 %v2779_v61, %v2777_v59  ;;  %v2791_v14 = vadd.f32 %v709_v8, %v608_v62 }
  0xd1   : > { %1816 = vlog2.f32 %v686_v47  ;;  %v2826_v3 = vadd.f32 6.214608, %v972_v1 }
  0xd2   : > { %v2789_v13 = vadd.f32 %v769_v7, %v753_v2  ;;  %v768_v19 = vmul.f32 %v2791_v14, %v2787_v10  ;;  %1818 = vpow2.f32 %v654_v18  ;;  %v971_v2 = vmul.f32 -124999.5, %v2812_v49  ;;  %v573_v18 = vld [vmem:[%s2597_s20 + $0x8] sm:$0xff] }
  0xd3   : > { %1820 = vpow2.f32 %v652_v20  ;;  %v605_v7 = vmax.f32 %v2767_v50, 0.0  ;;  %v604_v50 = vmax.f32 %v2774_v15, 0.0 }
  0xd4   : > { %808 = vmatpush.xpose.msra.mxu0 %v2789_v13  ;;  %v2797_v22 = vadd.f32 %v768_v19, %v752_v16  ;;  %v2828_v31 = vadd.f32 6.214608, %v971_v2  ;;  %v1052_v16 = vand.u32 2147483647, %v2826_v3  ;;  %v2839_v19 = vadd.f32 6.214608, %v970_v6 }
  0xd5   : > { %v1815_v25 = vpop.eup %1814  ;;  %v871_v2 = vmul.f32 %v574_v43, %v574_v43 }
  0xd6   : > { %v707_v32 = vmul.f32 0.6931472, %v1815_v25  ;;  %v1051_v47 = vand.u32 2147483647, %v2828_v31  ;;  %v749_v25 = vld [vmem:[%s2589_s13 + $0x8] sm:$0xff] }
  0xd7   : > { %v1817_v28 = vpop.eup %1816 }
  0xd8   : > { %809 = vmatpush.xpose.msra.mxu0 %v2797_v22  ;;  %v1819_v34 = vpop.eup %1818  ;;  %v705_v39 = vmul.f32 0.6931472, %v1817_v28  ;;  %v735_v42 = vadd.f32 %v707_v32, %v607_v27  ;;  %v572_v32 = vld [vmem:[%s2597_s20] sm:$0xff] }
  0xd9   : > { %v1821_v44 = vpop.eup %1820  ;;  %v685_v53 = vadd.f32 1.0, %v1819_v34  ;;  %v1067_v34 = vsub.f32 0.0, %v1051_v47  ;;  %v875_v47 = vmul.f32 %v2746_v40, %v2746_v40 }
  0xda   : > { %v734_v52 = vadd.f32 %v705_v39, %v606_v29  ;;  %v767_v11 = vmul.f32 %v735_v42, %v2803_v37  ;;  %v684_v58 = vadd.f32 1.0, %v1821_v44  ;;  %v1068_v29 = vsub.f32 0.0, %v1052_v16 }
  0xdb   : > { %1822 = vlog2.f32 %v685_v53  ;;  %v1050_v39 = vand.u32 2147483647, %v2839_v19  ;;  %v2853_v53 = vmul.f32 %v2711_v5, %v2711_v5 }
  0xdc   : > { %v766_v57 = vmul.f32 %v734_v52, %v574_v43  ;;  %v2817_v62 = vadd.f32 %v767_v11, %v751_v63  ;;  %1824 = vlog2.f32 %v684_v58  ;;  %v797_v43 = vld [vmem:[%s446_s1] sm:$0xff] }
  0xdd   : > { %1826 = vlog2.f32 %v734_v52  ;;  %v748_v52 = vld [vmem:[%s2589_s13] sm:$0xff]  ;;  %v2860_v1 = vsub.f32 0.0, %v1050_v39 }
  0xde   : > { %810 = vmatpush.xpose.msra.mxu0 %v2817_v62  ;;  %v782_v4 = vadd.f32 %v766_v57, %v750_v54  ;;  %1828 = vlog2.f32 %v735_v42  ;;  %v2849_v42 = vadd.f32 6.214608, %v969_v38  ;;  %v2855_v54 = vmul.f32 1.442695, %v1068_v29 }
  0xdf   : > { %v870_v57 = vmul.f32 %v573_v18, %v573_v18  ;;  %v2881_v40 = vmul.f32 %v2817_v62, %v2817_v62 }
  0xe0   : > { %v1049_v16 = vand.u32 2147483647, %v2849_v42 }
  0xe1   : > { %v1823_v8 = vpop.eup %1822 }
  0xe2   : > { %811 = vmatpush.xpose.msra.mxu0 %v782_v4  ;;  %v703_v21 = vmul.f32 0.6931472, %v1823_v8  ;;  %v1825_v45 = vpop.eup %1824 }
  0xe3   : > { %v701_v28 = vmul.f32 0.6931472, %v1825_v45  ;;  %v1827_v15 = vpop.eup %1826  ;;  %v869_v45 = vmul.f32 %v572_v32, %v572_v32 }
  0xe4   : > { %v733_v20 = vadd.f32 %v703_v21, %v605_v7  ;;  %v826_v7 = vmul.f32 0.6931472, %v1827_v15  ;;  %v874_v15 = vmul.f32 %v2777_v59, %v2777_v59 }
  0xe5   : > { %v732_v63 = vadd.f32 %v701_v28, %v604_v50 }
  0xe6   : > { %v765_v27 = vmul.f32 %v733_v20, %v573_v18  ;;  %1830 = vlog2.f32 %v733_v20  ;;  %v872_v18 = vmul.f32 %v2803_v37, %v2803_v37  ;;  %v887_v37 = vmul.f32 0.5, %v871_v2 }
  0xe7   : > { %1832 = vlog2.f32 %v2791_v14  ;;  %v764_v11 = vmul.f32 %v732_v63, %v572_v32  ;;  %v1829_v14 = vpop.eup %1828  ;;  %v873_v32 = vmul.f32 %v2787_v10, %v2787_v10  ;;  %v855_v39 = vsub.f32 0.0, %v826_v7 }
  0xe8   : > { %v781_v44 = vadd.f32 %v765_v27, %v749_v25  ;;  %1834 = vlog2.f32 %v2779_v61  ;;  %v2858_v61 = vmul.f32 1.442695, %v1067_v34  ;;  %v828_v50 = vmul.f32 0.6931472, %v1829_v14 }
  0xe9   : > { %1836 = vlog2.f32 %v732_v63  ;;  %v2862_v6 = vadd.f32 %v764_v11, %v748_v52  ;;  %v2875_v25 = vmul.f32 %v782_v4, %v782_v4  ;;  %v886_v27 = vmul.f32 0.5, %v870_v57 }
  0xea   : > { %812 = vmatpush.xpose.msra.mxu0 %v781_v44  ;;  %1838 = vlog2.f32 %v2752_v12  ;;  %v2864_v21 = vmul.f32 %v781_v44, %v781_v44  ;;  %v967_v12 = vmul.f32 -124999.5, %v2853_v53  ;;  %v885_v52 = vmul.f32 0.5, %v869_v45 }
  0xeb   : > { %v2888_v11 = vmul.f32 %v2797_v22, %v2797_v22  ;;  %v888_v10 = vmul.f32 0.5, %v872_v18  ;;  %v856_v14 = vsub.f32 0.0, %v828_v50  ;;  %v959_v62 = vmul.f32 -124999.5, %v2875_v25 }
  0xec   : > { %v1831_v58 = vpop.eup %1830  ;;  %v958_v44 = vmul.f32 -124999.5, %v2864_v21  ;;  %v960_v45 = vmul.f32 -124999.5, %v2881_v40  ;;  %v903_v59 = vsub.f32 %v855_v39, %v887_v37  ;;  %v2900_v18 = vmul.f32 %v2715_v17, %v2715_v17 }
  0xed   : > { %v1833_v5 = vpop.eup %1832  ;;  %v824_v8 = vmul.f32 0.6931472, %v1831_v58  ;;  %v890_v50 = vmul.f32 0.5, %v874_v15  ;;  %1840 = vpow2.f32 %v2855_v54 }
  0xee   : > { %813 = vmatpush.xpose.msra.mxu0 %v2862_v6  ;;  %v1835_v20 = vpop.eup %1834  ;;  %v830_v29 = vmul.f32 0.6931472, %v1833_v5  ;;  %v2893_v5 = vmul.f32 %v2789_v13, %v2789_v13  ;;  %v961_v13 = vmul.f32 -124999.5, %v2888_v11  ;;  %1842 = vpow2.f32 %v2858_v61 }
  0xef   : > { %v854_v38 = vsub.f32 0.0, %v824_v8  ;;  %v1837_v28 = vpop.eup %1836  ;;  %v832_v4 = vmul.f32 0.6931472, %v1835_v20  ;;  %v889_v8 = vmul.f32 0.5, %v873_v32  ;;  %v2904_v20 = vmul.f32 %v2761_v30, %v2761_v30 }
  0xf0   : > { %v1839_v34 = vpop.eup %1838  ;;  %v822_v63 = vmul.f32 0.6931472, %v1837_v28  ;;  %v857_v7 = vsub.f32 0.0, %v830_v29  ;;  %v2907_v28 = vadd.f32 6.214608, %v959_v62  ;;  %v2911_v32 = vmul.f32 %v2758_v26, %v2758_v26 }
  0xf1   : > { %814 = vmatmul.f32.vlgmr.msra.gmra.mxu0 %v797_v43  ;;  %v902_v57 = vsub.f32 %v854_v38, %v886_v27  ;;  %v834_v2 = vmul.f32 0.6931472, %v1839_v34  ;;  %v2896_v43 = vadd.f32 6.214608, %v958_v44  ;;  %v858_v38 = vsub.f32 0.0, %v832_v4 }
  0xf2   : > { %v853_v58 = vsub.f32 0.0, %v822_v63  ;;  %v904_v27 = vsub.f32 %v856_v14, %v888_v10  ;;  %v891_v34 = vmul.f32 0.5, %v875_v47  ;;  %v962_v17 = vmul.f32 -124999.5, %v2893_v5 }
  0xf3   : > { %v859_v37 = vsub.f32 0.0, %v834_v2  ;;  %v905_v39 = vsub.f32 %v857_v7, %v889_v8  ;;  %v2914_v44 = vadd.f32 6.214608, %v960_v45  ;;  %v1038_v30 = vand.u32 2147483647, %v2896_v43 }
  0xf4   : > { %v901_v22 = vsub.f32 %v853_v58, %v885_v52  ;;  %v2919_v52 = vmul.f32 %v2704_v56, %v2704_v56  ;;  %v2921_v4 = vadd.f32 6.214608, %v967_v12  ;;  %v963_v15 = vmul.f32 -124999.5, %v2904_v20 }
  0xf5   : > { %v2924_v26 = vadd.f32 6.214608, %v961_v13  ;;  %v2928_v47 = vmul.f32 %v2739_v60, %v2739_v60  ;;  %v906_v10 = vsub.f32 %v858_v38, %v890_v50  ;;  %v1039_v14 = vand.u32 2147483647, %v2907_v28 }
  0xf6   : > { %v917_v29 = vadd.f32 %v902_v57, %v901_v22  ;;  %v966_v57 = vmul.f32 -124999.5, %v2900_v18  ;;  %v964_v58 = vmul.f32 -124999.5, %v2911_v32  ;;  %v2933_v56 = vadd.f32 6.214608, %v962_v17 }
  0xf7   : > { %v907_v12 = vsub.f32 %v859_v37, %v891_v34  ;;  %v1040_v2 = vand.u32 2147483647, %v2914_v44  ;;  %v1054_v7 = vsub.f32 0.0, %v1038_v30  ;;  %v968_v60 = vmul.f32 -124999.5, %v2919_v52 }
  0xf8   : > { %v918_v63 = vadd.f32 %v917_v29, %v903_v59  ;;  %v2938_v45 = vadd.f32 6.214608, %v963_v15  ;;  %v1041_v59 = vand.u32 2147483647, %v2924_v26  ;;  %v1047_v22 = vand.u32 2147483647, %v2921_v4 }
  0xf9   : > { %v965_v50 = vmul.f32 -124999.5, %v2928_v47  ;;  %v1055_v13 = vsub.f32 0.0, %v1039_v14  ;;  %v2946_v29 = vadd.f32 6.214608, %v964_v58  ;;  %v1056_v34 = vsub.f32 0.0, %v1040_v2 }
  0xfa   : > { %v919_v62 = vadd.f32 %v918_v63, %v904_v27  ;;  %v2944_v27 = vadd.f32 6.214608, %v966_v57  ;;  %v1042_v54 = vand.u32 2147483647, %v2933_v56  ;;  %v1095_v37 = vmul.f32 1.442695, %v2860_v1  ;;  %v2962_v1 = vpop.eup %1840 }
  0xfb   : > { %v1071_v17 = vmul.f32 1.442695, %v1054_v7  ;;  %v1065_v30 = vsub.f32 0.0, %v1049_v16  ;;  %v2952_v63 = vadd.f32 6.214608, %v968_v60  ;;  %v2960_v57 = vmul.f32 %v2862_v6, %v2862_v6 }
  0xfc   : > { %v920_v8 = vadd.f32 %v919_v62, %v905_v39  ;;  %v1043_v15 = vand.u32 2147483647, %v2938_v45  ;;  %v2955_v61 = vadd.f32 6.214608, %v965_v50  ;;  %v1073_v14 = vmul.f32 1.442695, %v1055_v13 }
  0xfd   : > { %v1063_v58 = vsub.f32 0.0, %v1047_v22  ;;  %v1044_v16 = vand.u32 2147483647, %v2946_v29  ;;  %v1058_v2 = vsub.f32 0.0, %v1042_v54  ;;  %v1075_v7 = vmul.f32 1.442695, %v1056_v34 }
  0xfe   : > { %v921_v38 = vadd.f32 %v920_v8, %v906_v10  ;;  %v1057_v10 = vsub.f32 0.0, %v1041_v59  ;;  %1844 = vpow2.f32 %v1071_v17  ;;  %v957_v60 = vmul.f32 -124999.5, %v2960_v57  ;;  %v2968_v59 = vpop.eup %1842 }
  0xff   : > { %1846 = vpow2.f32 %v1095_v37  ;;  %v1059_v6 = vsub.f32 0.0, %v1043_v15  ;;  %v1045_v13 = vand.u32 2147483647, %v2955_v61  ;;  %v1048_v54 = vand.u32 2147483647, %v2952_v63 }
 0x100   : > { %v922_v39 = vadd.f32 %v921_v38, %v907_v12  ;;  %v1046_v12 = vand.u32 2147483647, %v2944_v27  ;;  %v1077_v50 = vmul.f32 1.442695, %v1057_v10  ;;  %1848 = vpow2.f32 %v1073_v14 }
 0x101   : > { %v2972_v38 = vadd.f32 6.214608, %v957_v60  ;;  %v1089_v34 = vmul.f32 1.442695, %v1063_v58  ;;  %1850 = vpow2.f32 %v1075_v7  ;;  %v1061_v10 = vsub.f32 0.0, %v1045_v13 }
 0x102   : > { %v923_v62 = vadd.f32 %v922_v39, %v2769_v51  ;;  %v1093_v51 = vmul.f32 1.442695, %v1065_v30  ;;  %v1062_v17 = vsub.f32 0.0, %v1046_v12  ;;  %v1079_v39 = vmul.f32 1.442695, %v1058_v2 }
 0x103   : > { %v1037_v37 = vand.u32 2147483647, %v2972_v38  ;;  %v1081_v30 = vmul.f32 1.442695, %v1059_v6  ;;  %1852 = vpow2.f32 %v1077_v50  ;;  %v1064_v60 = vsub.f32 0.0, %v1048_v54 }
 0x104   : > { %v924_v8 = vadd.f32 %v923_v62, %v2763_v35  ;;  %v1060_v35 = vsub.f32 0.0, %v1044_v16  ;;  %v1845_v15 = vpop.eup %1844  ;;  %1854 = vpow2.f32 %v1093_v51  ;;  %v1087_v58 = vmul.f32 1.442695, %v1062_v17 }
 0x105   : > { %v1053_v14 = vsub.f32 0.0, %v1037_v37  ;;  %1856 = vpow2.f32 %v1089_v34  ;;  %v1102_v7 = vadd.f32 1.0, %v1845_v15  ;;  %v1085_v50 = vmul.f32 1.442695, %v1061_v10 }
 0x106   : > { %v925_v22 = vadd.f32 %v924_v8, %v2725_v36  ;;  %v2978_v8 = vpop.eup %1846  ;;  %v1083_v16 = vmul.f32 1.442695, %v1060_v35  ;;  %1858 = vpow2.f32 %v1079_v39  ;;  %v1091_v54 = vmul.f32 1.442695, %v1064_v60 }
 0x107   : > { %v1849_v12 = vpop.eup %1848  ;;  %v1069_v2 = vmul.f32 1.442695, %v1053_v14  ;;  %1860 = vpow2.f32 %v1081_v30  ;;  %v1006_v60 = vmax.f32 %v2896_v43, 0.0  ;;  %v1008_v43 = vmax.f32 %v2914_v44, 0.0 }
 0x108   : > { %v926_v62 = vadd.f32 %v925_v22, %v2723_v9  ;;  %v1851_v6 = vpop.eup %1850  ;;  %v1103_v13 = vadd.f32 1.0, %v1849_v12  ;;  %v994_v44 = vmul.f32 -0.5, %v2893_v5 }
 0x109   : > { %1862 = vpow2.f32 %v1069_v2  ;;  %v1104_v35 = vadd.f32 1.0, %v1851_v6 }
 0x10a   : > { %v927_v36 = vadd.f32 %v926_v62, %v2718_v23  ;;  %v1853_v23 = vpop.eup %1852  ;;  %1864 = vpow2.f32 %v1087_v58 }
 0x10b   : > { %v2982_v22 = vpop.eup %1854  ;;  %1866 = vpow2.f32 %v1083_v16  ;;  %v1105_v39 = vadd.f32 1.0, %v1853_v23 }
 0x10c   : > { %v928_v9 = vadd.f32 %v927_v36, %v2702_v55  ;;  %v1857_v17 = vpop.eup %1856  ;;  %1868 = vlog2.f32 %v1102_v7  ;;  %v1007_v7 = vmax.f32 %v2907_v28, 0.0  ;;  %v993_v28 = vmul.f32 -0.5, %v2888_v11 }
 0x10d   : > { %v1859_v55 = vpop.eup %1858  ;;  %1870 = vpow2.f32 %v1085_v50  ;;  %v1111_v16 = vadd.f32 1.0, %v1857_v17  ;;  %v989_v50 = vmul.f32 -0.5, %v2960_v57  ;;  %v1009_v57 = vmax.f32 %v2924_v26, 0.0 }
 0x10e   : > { %v929_v51 = vadd.f32 %v928_v9, %v2695_v46  ;;  %v1861_v37 = vpop.eup %1860  ;;  %1872 = vlog2.f32 %v1103_v13  ;;  %v1106_v10 = vadd.f32 1.0, %v1859_v55  ;;  %v995_v26 = vmul.f32 -0.5, %v2904_v20 }
 0x10f   : > { %v1863_v46 = vpop.eup %1862  ;;  %1874 = vpow2.f32 %v1091_v54  ;;  %v1107_v9 = vadd.f32 1.0, %v1861_v37 }
 0x110   : > { %v930_v34 = vadd.f32 %v929_v51, %v2690_v41  ;;  %v1865_v15 = vpop.eup %1864  ;;  %1876 = vlog2.f32 %v1104_v35  ;;  %v1101_v36 = vadd.f32 1.0, %v1863_v46  ;;  %v990_v41 = vmul.f32 -0.5, %v2864_v21 }
 0x111   : > { %v1867_v14 = vpop.eup %1866  ;;  %1878 = vlog2.f32 %v1105_v39  ;;  %v1005_v51 = vmax.f32 %v2972_v38, 0.0  ;;  %v992_v21 = vmul.f32 -0.5, %v2881_v40 }
 0x112   : > { %v931_v62 = vadd.f32 %v930_v34, %v2681_v33  ;;  %v1869_v12 = vpop.eup %1868  ;;  %v991_v33 = vmul.f32 -0.5, %v2875_v25  ;;  %1880 = vlog2.f32 %v1101_v36  ;;  %v1108_v13 = vadd.f32 1.0, %v1867_v14  ;;  %v820_v36 = vld [vmem:[#allocation2] sm:$0x1] }
 0x113   : > { %v1871_v2 = vpop.eup %1870  ;;  %1882 = vlog2.f32 %v1106_v10  ;;  %v1110_v34 = vadd.f32 1.0, %v1865_v15  ;;  %v1022_v17 = vadd.f32 %v1006_v60, %v990_v41  ;;  %v1120_v25 = vmul.f32 0.6931472, %v1869_v12 }
 0x114   : > { %v932_v30 = vrot.slane %v931_v62, 4  ;;  %v1873_v23 = vpop.eup %1872  ;;  %v1109_v39 = vadd.f32 1.0, %v1871_v2  ;;  %1884 = vlog2.f32 %v1107_v9  ;;  %v1010_v15 = vmax.f32 %v2933_v56, 0.0 }
 0x115   : > { %v1875_v54 = vpop.eup %1874  ;;  %v1122_v37 = vmul.f32 0.6931472, %v1873_v23  ;;  %1886 = vlog2.f32 %v1108_v13  ;;  %v1024_v10 = vadd.f32 %v1008_v43, %v992_v21  ;;  %v1150_v41 = vadd.f32 %v1120_v25, %v1022_v17 }
 0x116   : > { %v933_v58 = vadd.f32 %v932_v30, %v931_v62  ;;  %v1877_v55 = vpop.eup %1876  ;;  %v1023_v62 = vadd.f32 %v1007_v7, %v991_v33  ;;  %v1021_v30 = vadd.f32 %v1005_v51, %v989_v50  ;;  %1888 = vlog2.f32 %v1109_v39 }
 0x117   : > { %v1879_v38 = vpop.eup %1878  ;;  %v1124_v14 = vmul.f32 0.6931472, %v1877_v55  ;;  %v1011_v12 = vmax.f32 %v2938_v45, 0.0  ;;  %v1025_v9 = vadd.f32 %v1009_v57, %v993_v28  ;;  %v1112_v50 = vadd.f32 1.0, %v1875_v54 }
 0x118   : > { %v934_v6 = vrot.slane %v933_v58, 2  ;;  %v1881_v40 = vpop.eup %1880  ;;  %v1126_v33 = vmul.f32 0.6931472, %v1879_v38  ;;  %v1151_v2 = vadd.f32 %v1122_v37, %v1023_v62  ;;  %1890 = vlog2.f32 %v1110_v34 }
 0x119   : > { %v1883_v11 = vpop.eup %1882  ;;  %v996_v56 = vmul.f32 -0.5, %v2911_v32  ;;  %v1012_v51 = vmax.f32 %v2946_v29, 0.0  ;;  %v1026_v23 = vadd.f32 %v1010_v15, %v994_v44  ;;  %v1152_v21 = vadd.f32 %v1124_v14, %v1024_v10 }
 0x11a   : > { %v935_v35 = vadd.f32 %v934_v6, %v933_v58  ;;  %v1118_v58 = vmul.f32 0.6931472, %v1881_v40  ;;  %v1885_v5 = vpop.eup %1884  ;;  %v1128_v13 = vmul.f32 0.6931472, %v1883_v11  ;;  %v1113_v45 = vadd.f32 1.0, %v2982_v22 }
 0x11b   : > { %v1887_v20 = vpop.eup %1886  ;;  %1892 = vlog2.f32 %v1111_v16  ;;  %v997_v17 = vmul.f32 -0.5, %v2928_v47  ;;  %v1013_v25 = vmax.f32 %v2955_v61, 0.0  ;;  %v1130_v54 = vmul.f32 0.6931472, %v1885_v5 }
 0x11c   : > { %v936_v46 = vrot.slane %v935_v35, 1  ;;  %v1149_v6 = vadd.f32 %v1118_v58, %v1021_v30  ;;  %v1153_v34 = vadd.f32 %v1126_v33, %v1025_v9  ;;  %v1889_v32 = vpop.eup %1888  ;;  %v1114_v29 = vadd.f32 1.0, %v2978_v8 }
 0x11d   : > { %1894 = vlog2.f32 %v1112_v50  ;;  %v998_v39 = vmul.f32 -0.5, %v2900_v18  ;;  %v1014_v28 = vmax.f32 %v2944_v27, 0.0  ;;  %v1028_v57 = vadd.f32 %v1012_v51, %v996_v56 }
 0x11e   : > { %v937_v60 = vadd.f32 %v936_v46, %v935_v35  ;;  %v1165_v43 = vadd.f32 %v1150_v41, %v1149_v6  ;;  %v1027_v35 = vadd.f32 %v1011_v12, %v995_v26  ;;  %v1132_v38 = vmul.f32 0.6931472, %v1887_v20  ;;  %v1891_v62 = vpop.eup %1890 }
 0x11f   : > { %v1154_v22 = vadd.f32 %v1128_v13, %v1026_v23  ;;  %v1115_v47 = vadd.f32 1.0, %v2968_v59  ;;  %1896 = vlog2.f32 %v1113_v45  ;;  %v999_v61 = vmul.f32 -0.5, %v2853_v53 }
 0x120   : > { %v938_v7 = vadd.f32 %v937_v60, %v820_v36  ;;  %v1166_v55 = vadd.f32 %v1165_v43, %v1151_v2  ;;  %v1015_v37 = vmax.f32 %v2921_v4, 0.0  ;;  %v1029_v46 = vadd.f32 %v1013_v25, %v997_v17 }
 0x121   : > { %v1134_v30 = vmul.f32 0.6931472, %v1889_v32  ;;  %v1155_v8 = vadd.f32 %v1130_v54, %v1027_v35  ;;  %v1893_v44 = vpop.eup %1892  ;;  %v1116_v18 = vadd.f32 1.0, %v2962_v1  ;;  %1898 = vlog2.f32 %v1114_v29 }
 0x122   : > { %939 = vst [vmem:[#allocation2] sm:$0x1] %v938_v7  ;;  %v1167_v16 = vadd.f32 %v1166_v55, %v1152_v21  ;;  %v1000_v27 = vmul.f32 -0.5, %v2919_v52  ;;  %v1016_v15 = vmax.f32 %v2952_v63, 0.0  ;;  %v1030_v10 = vadd.f32 %v1014_v28, %v998_v39 }
 0x123   : > { %v1136_v36 = vmul.f32 0.6931472, %v1891_v62  ;;  %v1156_v59 = vadd.f32 %v1132_v38, %v1028_v57  ;;  %v1895_v41 = vpop.eup %1894  ;;  %1900 = vlog2.f32 %v1115_v47  ;;  %v1001_v53 = vmul.f32 -0.5, %v2834_v24  ;;  %v940_v62 = vld [vmem:[#allocation3] sm:$0x1] }
 0x124   : > { %v1168_v40 = vadd.f32 %v1167_v16, %v1153_v34  ;;  %v1017_v4 = vmax.f32 %v2849_v42, 0.0  ;;  %v1031_v60 = vadd.f32 %v1015_v37, %v999_v61  ;;  %v1138_v58 = vmul.f32 0.6931472, %v1893_v44  ;;  %v796_v37 = vld [vmem:[%s2626_s2] sm:$0xff] }
 0x125   : > { %v1157_v11 = vadd.f32 %v1134_v30, %v1029_v46  ;;  %v1897_v1 = vpop.eup %1896  ;;  %1902 = vlog2.f32 %v1116_v18  ;;  %v1002_v52 = vmul.f32 -0.5, %v2823_v0  ;;  %v1018_v63 = vmax.f32 %v2839_v19, 0.0 }
 0x126   : > { %v1169_v14 = vadd.f32 %v1168_v40, %v1154_v22  ;;  %v1032_v12 = vadd.f32 %v1016_v15, %v1000_v27  ;;  %v1140_v9 = vmul.f32 0.6931472, %v1895_v41  ;;  %v1158_v33 = vadd.f32 %v1136_v36, %v1030_v10 }
 0x127   : > { %v1899_v7 = vpop.eup %1898  ;;  %v1003_v6 = vmul.f32 -0.5, %v2812_v49  ;;  %v1019_v24 = vmax.f32 %v2828_v31, 0.0  ;;  %v1033_v42 = vadd.f32 %v1017_v4, %v1001_v53  ;;  %v1142_v5 = vmul.f32 0.6931472, %v1897_v1 }
 0x128   : > { %v1170_v26 = vadd.f32 %v1169_v14, %v1155_v8  ;;  %v1159_v50 = vadd.f32 %v1138_v58, %v1031_v60  ;;  %v1004_v23 = vmul.f32 -0.5, %v2808_v48  ;;  %v1020_v0 = vmax.f32 %v2826_v3, 0.0 }
 0x129   : > { %v1901_v51 = vpop.eup %1900  ;;  %v1034_v13 = vadd.f32 %v1018_v63, %v1002_v52  ;;  %v1144_v19 = vmul.f32 0.6931472, %v1899_v7  ;;  %v1160_v21 = vadd.f32 %v1140_v9, %v1032_v12  ;;  %v1035_v45 = vadd.f32 %v1019_v24, %v1003_v6 }
 0x12a   : > { %v1171_v2 = vadd.f32 %v1170_v26, %v1156_v59  ;;  %v1146_v17 = vmul.f32 0.6931472, %v1901_v51  ;;  %v1161_v25 = vadd.f32 %v1142_v5, %v1033_v42  ;;  %v1036_v35 = vadd.f32 %v1020_v0, %v1004_v23 }
 0x12b   : > { %v1903_v20 = vpop.eup %1902  ;;  %v1162_v54 = vadd.f32 %v1144_v19, %v1034_v13 }
 0x12c   : > { %v1172_v56 = vadd.f32 %v1171_v2, %v1157_v11  ;;  %v1148_v31 = vmul.f32 0.6931472, %v1903_v20  ;;  %v1163_v55 = vadd.f32 %v1146_v17, %v1035_v45 }
 0x12e   : > { %v1173_v43 = vadd.f32 %v1172_v56, %v1158_v33  ;;  %v1164_v29 = vadd.f32 %v1148_v31, %v1036_v35 }
 0x130   : > { %v1174_v49 = vadd.f32 %v1173_v43, %v1159_v50 }
 0x132   : > { %v1175_v34 = vadd.f32 %v1174_v49, %v1160_v21 }
 0x134   : > { %v1176_v32 = vadd.f32 %v1175_v34, %v1161_v25 }
 0x136   : > { %v1177_v48 = vadd.f32 %v1176_v32, %v1162_v54 }
 0x138   : > { %v1178_v3 = vadd.f32 %v1177_v48, %v1163_v55 }
 0x13a   : > { %v1179_v39 = vadd.f32 %v1178_v3, %v1164_v29 }
 0x13c   : > { %v1180_v28 = vrot.slane %v1179_v39, 4 }
 0x13e   : > { %v1181_v57 = vadd.f32 %v1180_v28, %v1179_v39 }
 0x140   : > { %v1182_v38 = vrot.slane %v1181_v57, 2 }
 0x142   : > { %v1183_v22 = vadd.f32 %v1182_v38, %v1181_v57 }
 0x144   : > { %v1184_v16 = vrot.slane %v1183_v22, 1 }
 0x146   : > { %v1185_v47 = vadd.f32 %v1184_v16, %v1183_v22 }
 0x148   : > { %v1186_v61 = vadd.f32 %v1185_v47, %v940_v62 }
 0x14a   : > { %1187 = vst [vmem:[#allocation3] sm:$0x1] %v1186_v61 }
 0x16d   : > { %1191 = sbr.rel (%p1570_p4) target bundleno = 617 (0x269), region = 80 }
 0x16e   : > { %v815_v46 = vpop.f32.mrf.mxu0 }
 0x16f   : > { %v818_v30 = vadd.f32 %v815_v46, %v796_v37 }
 0x171   : > { %819 = vst [vmem:[%s2626_s2] sm:$0xff] %v818_v30 }
 0x172   : > { %v1193_v8 = vld [vmem:[%s485_s11] sm:$0x1]  ;;  %vm1213_vm0 = vcmask 1040384   ;;  %v1217_v42 = vld [vmem:[#allocation3] sm:$0x1]  ;;  %v1261_v62 = vlaneseq }
 0x173   : > { %v1195_v40 = vand.u32 2147483647, %v1193_v8  ;;  %v1194_v10 = vmax.f32 %v1193_v8, 0.0  ;;  %v1192_v14 = vld [vmem:[%s494_s5] sm:$0x1]  ;;  %v1218_v51 = vsel %vm1213_vm0, %v1217_v42, 0.0 }
 0x174   : > { %v1203_v53 = vld [vmem:[%s564_s25] sm:$0x1]  ;;  %v1224_v11 = vmul.f32 %v1192_v14, %v1192_v14  ;;  %v1262_v47 = vand.u32 127, %v1261_v62 }
 0x175   : > { %v1196_v44 = vsub.f32 0.0, %v1195_v40  ;;  %v1212_v52 = vld [vmem:[#allocation2] sm:$0x1] }
 0x176   : > { %v1214_v33 = vsel %vm1213_vm0, %v1212_v52, 0.0  ;;  %v1225_v7 = vmul.f32 0.5, %v1224_v11  ;;  %vm1263_vm1 = vcmp.eq.s32.totalorder %v1262_v47, 0  ;;  %vm1266_vm2 = vcmp.eq.s32.totalorder %v1262_v47, 1 }
 0x177   : > { %v1197_v18 = vmul.f32 1.442695, %v1196_v44  ;;  %1215 = vadd.xlane.f32.xlu1 %v1214_v33  ;;  %vm1270_vm3 = vcmp.eq.s32.totalorder %v1262_v47, 2  ;;  %vm1274_vm4 = vcmp.eq.s32.totalorder %v1262_v47, 3 }
 0x178   : > { %v1206_v58 = vld [vmem:[%s2626_s2] sm:$0xff] }
 0x179   : > { %1904 = vpow2.f32 %v1197_v18 }
 0x17f   : > { %v1905_v27 = vpop.eup %1904  ;;  %1219 = vadd.xlane.f32.xlu1 %v1218_v51 }
 0x180   : > { %v1199_v15 = vadd.f32 1.0, %v1905_v27 }
 0x182   : > { %1906 = vlog2.f32 %v1199_v15 }
 0x188   : > { %v1907_v36 = vpop.eup %1906 }
 0x189   : > { %v1201_v59 = vmul.f32 0.6931472, %v1907_v36 }
 0x18b   : > { %v1202_v41 = vadd.f32 %v1201_v59, %v1194_v10 }
 0x18d   : > { %1908 = vlog2.f32 %v1202_v41  ;;  %v1204_v4 = vmul.f32 %v1202_v41, %v1192_v14 }
 0x18f   : > { %v1205_v60 = vadd.f32 %v1204_v4, %v1203_v53 }
 0x191   : > { %v1208_v26 = vperm.slane %v1205_v60, 0  ;;  %v1237_v1 = vmul.f32 %v1205_v60, %v1205_v60 }
 0x193   : > { %v1909_v63 = vpop.eup %1908  ;;  %v1210_v12 = vadd.f32 %v1208_v26, %v1206_v58  ;;  %v1238_v9 = vmul.f32 -124999.5, %v1237_v1  ;;  %v1240_v21 = vmul.f32 -0.5, %v1237_v1 }
 0x194   : > { %v1222_v2 = vmul.f32 0.6931472, %v1909_v63 }
 0x195   : > { %1211 = vst [vmem:[%s2626_s2] sm:$0xff] %v1210_v12  ;;  %v1239_v6 = vadd.f32 6.214608, %v1238_v9 }
 0x196   : > { %v1223_v24 = vsub.f32 0.0, %v1222_v2 }
 0x197   : > { %v1243_v5 = vand.u32 2147483647, %v1239_v6  ;;  %v1241_v43 = vmax.f32 %v1239_v6, 0.0 }
 0x198   : > { %v1226_v50 = vsub.f32 %v1223_v24, %v1225_v7 }
 0x199   : > { %v1244_v56 = vsub.f32 0.0, %v1243_v5  ;;  %v1242_v20 = vadd.f32 %v1241_v43, %v1240_v21 }
 0x19a   : > { %v1227_v23 = vsel %vm1213_vm0, %v1226_v50, 0.0 }
 0x19b   : > { %1228 = vadd.xlane.f32.xlu0 %v1227_v23  ;;  %v1245_v0 = vmul.f32 1.442695, %v1244_v56 }
 0x19d   : > { %1910 = vpow2.f32 %v1245_v0 }
 0x1a3   : > { %v1911_v13 = vpop.eup %1910 }
 0x1a4   : > { %v1247_v19 = vadd.f32 1.0, %v1911_v13 }
 0x1a6   : > { %1912 = vlog2.f32 %v1247_v19 }
 0x1ac   : > { %v1913_v45 = vpop.eup %1912 }
 0x1ad   : > { %v1249_v17 = vmul.f32 0.6931472, %v1913_v45 }
 0x1af   : > { %v1250_v25 = vadd.f32 %v1249_v17, %v1242_v20 }
 0x1b1   : > { %v1251_v49 = vsel %vm1213_vm0, %v1250_v25, 0.0 }
 0x1b2   : > { %1252 = vadd.xlane.f32.xlu0 %v1251_v49 }
 0x1ea   : > { %v1216_v16 = vpop.xlane.xlu1 %1215 }
 0x1eb   : > { %v1264_v37 = vperm.slane %v1216_v16, 0 }
 0x1ed   : > { %v1265_v30 = vsel %vm1263_vm1, %v1264_v37, 0.0 }
 0x1f2   : > { %v1220_v61 = vpop.xlane.xlu1 %1219 }
 0x1f3   : > { %v1267_v46 = vperm.slane %v1220_v61, 0 }
 0x1f5   : > { %v1268_v8 = vsel %vm1266_vm2, %v1267_v46, 0.0 }
 0x1f6   : > { %v1269_v44 = vadd.f32 %v1268_v8, %v1265_v30 }
 0x20e   : > { %v1229_v35 = vpop.xlane.xlu0 %1228 }
 0x20f   : > { %v1230_v31 = vrot.slane %v1229_v35, 4 }
 0x211   : > { %v1231_v54 = vadd.f32 %v1230_v31, %v1229_v35 }
 0x213   : > { %v1232_v34 = vrot.slane %v1231_v54, 2 }
 0x215   : > { %v1233_v55 = vadd.f32 %v1232_v34, %v1231_v54 }
 0x217   : > { %v1234_v32 = vrot.slane %v1233_v55, 1 }
 0x219   : > { %v1235_v29 = vadd.f32 %v1234_v32, %v1233_v55 }
 0x21b   : > { %1580 = vpush %v1235_v29 }
 0x225   : > { %v1253_v48 = vpop.xlane.xlu0 %1252 }
 0x226   : > { %v1254_v3 = vrot.slane %v1253_v48, 4 }
 0x228   : > { %v1255_v39 = vadd.f32 %v1254_v3, %v1253_v48 }
 0x22a   : > { %v1256_v28 = vrot.slane %v1255_v39, 2 }
 0x22c   : > { %v1257_v57 = vadd.f32 %v1256_v28, %v1255_v39 }
 0x22e   : > { %v1258_v38 = vrot.slane %v1257_v57, 1 }
 0x230   : > { %v1259_v22 = vadd.f32 %v1258_v38, %v1257_v57 }
 0x232   : > { %1582 = vpush %v1259_v22 }
 0x24c   : > { %s1581_s13 = spop %1580 }
 0x24d   : > { %v1271_v40 = vstv %s1581_s13 }
 0x24e   : > { %v1272_v18 = vsel %vm1270_vm3, %v1271_v40, 0.0 }
 0x24f   : > { %v1273_v27 = vadd.f32 %v1272_v18, %v1269_v44 }
 0x263   : > { %s1583_s24 = spop %1582 }
 0x264   : > { %v1275_v15 = vstv %s1583_s24 }
 0x265   : > { %v1276_v10 = vsel %vm1274_vm4, %v1275_v15, 0.0 }
 0x266   : > { %v1277_v36 = vadd.f32 %v1276_v10, %v1273_v27 }
 0x268   : > { %1278 = vst [vmem:[%s2628_s16] sm:$0xff] %v1277_v36 }
 0x269 PF: > { %s3194_s26 = sld [smem:[#allocation28_spill]]  ;;  %s1297_s4 = sshll.u32 %s2626_s2, 4  ;;  %s1298_s4 = int_to_ptr.vmem [resolvable:$true] %s1297_s4 }
 0x26a   : > { %s3195_s5 = sld [smem:[#allocation43_spill]]  ;;  %s1280_s30 = scalar_lea.sflag [#allocation6], %s2604_s14 }
 0x26f   : > { %s1573_s20 = sshll.u32 %s3194_s26, 3 }
 0x270   : > { %s1295_s3 = scalar_lea.hbm %s3195_s5, %s1573_s20  ;;  %s2114_s15 = scalar_lea.hbm %s3195_s5, 24 }
 0x271   : > { %s1299_s6 = sshll.u32 %s1295_s3, 4  ;;  %s1300_s6 = int_to_ptr.hbm [resolvable:$true] %s1299_s6 }
 0x272   : > { %s2108_s12 = sshra.s32 %s1300_s6, 4  ;;  %s2109_s12 = int_to_ptr.hbm [resolvable:$true] %s2108_s12 }
 0x273   : > { %s2110_s25 = scalar_lea.hbm %s2109_s12, 8  ;;  %p2115_p12 = scmp.lt.s32.totalorder %s2109_s12, %s3195_s5 }
 0x274   : > { %p2111_p6 = scmp.ne.s32.totalorder %s2109_s12, %s2110_s25  ;;  %p2116_p13 = scmp.lt.s32.totalorder %s2114_s15, %s2110_s25 }
 0x276   : > { %p2112_p7 = pnand %p2111_p6, %p2556_p2  ;;  %p2117_p1 = por %p2116_p13, %p2115_p12 }
 0x278   : > { %p2113_p11 = pneg %p2112_p7 }
 0x27a   : > { %p2118_p9 = pnand %p2117_p1, %p2113_p11 }
 0x27c   : > { %2121 = shalt.err (!%p2118_p9)
}
 0x27d   : > { %1596 = dma.vmem_to_hbm [thread:$0]  (%p2556_p2), %s1298_s4, 128, %s1300_s6, %s1280_s30  }
 0x27e   : > { %s3196_s24 = sld [smem:[#allocation44_spill]]  ;;  %s1311_s11 = sshll.u32 %s2628_s16, 4  ;;  %s1312_s11 = int_to_ptr.vmem [resolvable:$true] %s1311_s11 }
 0x27f   : > { %s1285_s3 = scalar_lea.sflag [#allocation17], %s2604_s14 }
 0x284   : > { %s1309_s26 = scalar_lea.hbm %s3196_s24, %s1573_s20  ;;  %s2142_s4 = scalar_lea.hbm %s3196_s24, 24 }
 0x285   : > { %s1313_s8 = sshll.u32 %s1309_s26, 4  ;;  %s1314_s8 = int_to_ptr.hbm [resolvable:$true] %s1313_s8 }
 0x286   : > { %s2136_s12 = sshra.s32 %s1314_s8, 4  ;;  %s2137_s12 = int_to_ptr.hbm [resolvable:$true] %s2136_s12 }
 0x287   : > { %s2138_s25 = scalar_lea.hbm %s2137_s12, 8  ;;  %p2143_p8 = scmp.lt.s32.totalorder %s2137_s12, %s3196_s24 }
 0x288   : > { %p2139_p5 = scmp.ne.s32.totalorder %s2137_s12, %s2138_s25  ;;  %p2144_p4 = scmp.lt.s32.totalorder %s2142_s4, %s2138_s25 }
 0x28a   : > { %p2140_p0 = pnand %p2139_p5, %p2556_p2  ;;  %p2145_p6 = por %p2144_p4, %p2143_p8 }
 0x28c   : > { %p2141_p3 = pneg %p2140_p0 }
 0x28e   : > { %p2146_p7 = pnand %p2145_p6, %p2141_p3 }
 0x290   : > { %2149 = shalt.err (!%p2146_p7)
}
 0x291   : > { %1597 = dma.vmem_to_hbm [thread:$0]  (%p2556_p2), %s1312_s11, 128, %s1314_s8, %s1285_s3  }
 0x292 PF: > { %p1627_p11 = scmp.ge.s32.totalorder %s2288_s18, 2  ;;  %s1325_s14 = sand.u32 1, %s2236_s27  }
 0x293   : > { %s1326_s16 = scalar_lea.sflag [#allocation6], %s1325_s14 }
 0x294   : > { %p1620_p12 = pnand %p1627_p11, %p2560_p10 }
 0x296   : > { %p1621_p13 = pneg %p1620_p12 }
 0x298   : > { %2227 = dma.done.wait (%p1621_p13), %s1326_s16, 128  }
 0x299   : > { %2229 = vsyncadd (%p1621_p13), %s1326_s16, 4294967168  ;;  %s1336_s20 = scalar_lea.sflag [#allocation17], %s1325_s14 }
 0x29a   : > { %2231 = dma.done.wait (%p1621_p13), %s1336_s20, 128  }
 0x29b   : > { %2233 = vsyncadd (%p1621_p13), %s1336_s20, 4294967168  ;;  %s37_s18 = sadd.s32 1, %s2288_s18   ;;  %s3198_s7 = sld [smem:[#allocation35_spill]] }
 0x29c   : > { %p3077_p1 = scmp.ge.s32.totalorder %s37_s18, 8   ;;  %s3199_s11 = sld [smem:[#allocation25_spill]] }
 0x29d   : > { %s3200_s12 = sld [smem:[#allocation26_spill]]  ;;  %s3205_s27 = smov %s2240_s28 }
 0x29e   : > { %s3201_s13 = sld [smem:[#allocation33_spill]]  ;;  %s3206_s28 = smov %s2244_s29 }
 0x29f   : > { %s3202_s14 = sld [smem:[#allocation29_spill]]  ;;  %s3207_s29 = smov %s2538_s22 }
 0x2a0   : > { %s3203_s16 = sld [smem:[#allocation31_spill]]  ;;  %s3208_s30 = smov %s2252_s9 }
 0x2a1   : > { %s3204_s1 = sld [smem:[#allocation32_spill]]  ;;  %s3209_s9 = smov %s2256_s10 }
 0x2a2   : > { %s3210_s10 = smov %s3198_s7  ;;  %s3211_s15 = smov %s2284_s17 }
 0x2a3   :  { %36 = sbr.rel (!%p3077_p1) target bundleno = 28 (0x1c), region = 182 }
 0x2a7   : > { %s3212_s17 = smov %s3204_s1 }
 0x2a8   :  { %1342 = vsyncpa [#allocation5], 1 }
 0x2a9   :  { %1344 = vsyncpa [#allocation5 + $0x1], 1 }
 0x2aa   :  { %1345 = vsyncpa [#allocation8], 1 }
 0x2ab   :  { %1347 = vsyncpa [#allocation8 + $0x1], 1 }
 0x2ac   :  { %1348 = vsyncpa [#allocation11], 1 }
 0x2ad   :  { %1350 = vsyncpa [#allocation11 + $0x1], 1 }
 0x2ae   :  { %1351 = vsyncpa [#allocation14], 1 }
 0x2af   :  { %1353 = vsyncpa [#allocation14 + $0x1], 1 }
 0x2b0   :  { %1354 = vsyncpa [#allocation6], 1 }
 0x2b1   :  { %1356 = vsyncpa [#allocation6 + $0x1], 1 }
 0x2b2   :  { %1357 = vsyncpa [#allocation17], 1 }
 0x2b3   :  { %1359 = vsyncpa [#allocation17 + $0x1], 1 }

</bundles_post_ra>
